<compile_context>
chip_gen: v7x
topology: tpu7x:2x2x1
jax: 0.10.0
libtpu: 0.0.40
codegen_flags: <defaults>
</compile_context>

<pallas_src>
import functools

import jax
import jax.numpy as jnp
from jax.experimental import pallas as pl
from jax.experimental.pallas import tpu as pltpu

HIDDEN = 300          # fixed by the module definition
HIDDEN_PAD = 384      # 3 full vregs of 128 lanes (col 300 carries the constant 1)


def _round_up(x, m):
    return ((x + m - 1) // m) * m


def _tensorcores_per_chip():
    """2 on v7x (grid 'parallel' axes shard across both TCs), else 1."""
    try:
        kind = jax.devices()[0].device_kind.lower()
    except Exception:
        return 1
    return 2 if ("v7" in kind or "7x" in kind) else 1


def _mlp_kernel(x_ref, w1_ref, wh_ref, w7_ref, o_ref, *, n_chunks, chunk_rows):
    """Full 7-layer MLP for one batch tile.

    Biases are pre-folded into a constant-1 activation column (see wrapper), so
    each layer is dot -> ReLU -> bf16 cast.  The tile is processed as
    `n_chunks` statically-unrolled row sub-chunks so chunk B's matmul (MXU
    slot) can overlap chunk A's ReLU/cast epilogue (VALU slot).
    """
    w1 = w1_ref[...]
    w7 = w7_ref[...]

    # Layer 1: (rows, in_pad) @ (in_pad, 384) -> ReLU -> bf16.
    hs = []
    for c in range(n_chunks):
        xc = x_ref[pl.ds(c * chunk_rows, chunk_rows), :].astype(jnp.bfloat16)
        y = jnp.dot(xc, w1, preferred_element_type=jnp.float32)
        hs.append(jnp.maximum(y, 0.0).astype(jnp.bfloat16))

    # Layers 2..6: five packed (384, 384) hidden layers (static unroll).
    for i in range(5):
        wi = wh_ref[i]
        hs = [
            jnp.maximum(
                jnp.dot(hs[c], wi, preferred_element_type=jnp.float32), 0.0
            ).astype(jnp.bfloat16)
            for c in range(n_chunks)
        ]

    # Layer 7: (rows, 384) @ (384, out_pad) -> Sigmoid (lane-dense store).
    for c in range(n_chunks):
        y = jnp.dot(hs[c], w7, preferred_element_type=jnp.float32)
        o_ref[pl.ds(c * chunk_rows, chunk_rows), :] = (
            jax.nn.sigmoid(y).astype(o_ref.dtype))


def _pack_params(params, in_size, out_size, in_pad, out_pad):
    """Zero-pad weights to 128-aligned shapes and fold the biases in.

    Column `in_size` of the padded input and column HIDDEN (=300) of every
    hidden activation are forced to the constant 1.0; writing each layer's
    bias into that weight row makes the MXU do the bias add for free, and a
    single 1.0 at (const_row, const_col) propagates the constant through ReLU.
    """
    w1, b1 = params[0]
    w1_full = jnp.zeros((in_pad, HIDDEN_PAD), jnp.float32)
    w1_full = w1_full.at[:in_size, :HIDDEN].set(w1)
    w1_full = w1_full.at[in_size, :HIDDEN].set(b1[0])
    w1_full = w1_full.at[in_size, HIDDEN].set(1.0)

    wh_full = jnp.zeros((5, HIDDEN_PAD, HIDDEN_PAD), jnp.float32)
    for i in range(5):
        w, b = params[1 + i]
        wh_full = wh_full.at[i, :HIDDEN, :HIDDEN].set(w)
        wh_full = wh_full.at[i, HIDDEN, :HIDDEN].set(b[0])
        wh_full = wh_full.at[i, HIDDEN, HIDDEN].set(1.0)

    w7, b7 = params[6]
    w7_full = jnp.zeros((HIDDEN_PAD, out_pad), jnp.float32)
    w7_full = w7_full.at[:HIDDEN, :out_size].set(w7)
    w7_full = w7_full.at[HIDDEN, :out_size].set(b7[0])

    return (w1_full.astype(jnp.bfloat16),
            wh_full.astype(jnp.bfloat16),
            w7_full.astype(jnp.bfloat16))


def _vmem_bytes_estimate(tile, in_pad, out_pad):
    """VMEM budget for one grid step (single 2x double-buffer factor)."""
    w_bytes = (in_pad * HIDDEN_PAD
               + 5 * HIDDEN_PAD * HIDDEN_PAD
               + HIDDEN_PAD * out_pad) * 2             # bf16 weights, one copy
    io_bytes = tile * (in_pad + out_pad) * 4           # x + o tiles (f32)
    act_bytes = 3 * tile * HIDDEN_PAD * 4              # live f32 acc + bf16 h
    return 2 * (w_bytes + io_bytes) + act_bytes


def neuralnet_forward(x, params, *, batch_tile=2048):
    """Forward pass of NeuralNet.

    x:      (B, in_size) float array.
    params: list of 7 (W, b) pairs, W: (in, out) = torch weight.T, b: (1, out).
    """
    B, in_size = x.shape
    out_size = params[-1][0].shape[1]

    # Reserve one padded input column for the constant-1 bias lane.
    in_pad = _round_up(in_size + 1, 128)
    out_pad = _round_up(out_size, 128)

    # M only needs sublane alignment (16 for packed bf16), not 128: keep small
    # batches small, let large batches use the full batch_tile.
    tile = max(16, min(batch_tile, _round_up(B, 16)))
    b_pad = _round_up(B, tile)
    # Only force >=2 grid steps on 2-TC chips (v7x) so the "parallel" batch
    # axis can shard across both TensorCores; on single-TC v5e/v6e splitting a
    # batch that fits one tile just adds a grid step of overhead.
    if _tensorcores_per_chip() >= 2:
        while b_pad // tile < 2 and tile >= 256:
            tile //= 2
            b_pad = _round_up(B, tile)
    grid_len = b_pad // tile

    # In-kernel sub-chunking (MXU/VPU overlap) only when the tile is large and
    # the sub-chunk stays 128-row aligned.
    n_chunks = 2 if tile % 256 == 0 else 1
    chunk_rows = tile // n_chunks

    # ---- Parameter prep: pad + fold biases, weights -> bf16 ----
    w1_p, wh_p, w7_p = _pack_params(params, in_size, out_size, in_pad, out_pad)

    # Zero-pad the input batch rows / feature columns; the extra column
    # `in_size` carries the constant 1.0 for the folded biases.  Padded weight
    # rows/cols are zero and padded output rows/cols are sliced away.
    x_p = jnp.pad(x, ((0, b_pad - B), (0, in_pad - in_size)))
    x_p = x_p.at[:, in_size].set(1.0)

    # ---- BlockSpecs: batch tiled along grid axis 0; params grid-invariant ----
    x_spec = pl.BlockSpec((tile, in_pad), lambda i: (i, 0))
    o_spec = pl.BlockSpec((tile, out_pad), lambda i: (i, 0))
    w1_spec = pl.BlockSpec((in_pad, HIDDEN_PAD), lambda i: (0, 0))
    wh_spec = pl.BlockSpec((5, HIDDEN_PAD, HIDDEN_PAD), lambda i: (0, 0, 0))
    w7_spec = pl.BlockSpec((HIDDEN_PAD, out_pad), lambda i: (0, 0))

    vmem_limit = int(min(max(_vmem_bytes_estimate(tile, in_pad, out_pad)
                             + (8 << 20),               # compiler scratch headroom
                             32 << 20),
                         56 << 20))                      # stay below v7x's 64 MiB

    weight_elems = (in_pad * HIDDEN_PAD + 5 * HIDDEN_PAD * HIDDEN_PAD
                    + HIDDEN_PAD * out_pad)
    cost = pl.CostEstimate(
        flops=2 * b_pad * weight_elems,
        transcendentals=b_pad * out_pad,                 # sigmoid exp
        bytes_accessed=b_pad * (in_pad + out_pad) * 4 + weight_elems * 2,
    )

    kernel = functools.partial(_mlp_kernel, n_chunks=n_chunks,
                               chunk_rows=chunk_rows)

    out_padded = pl.pallas_call(
        kernel,
        out_shape=jax.ShapeDtypeStruct((b_pad, out_pad), x.dtype),
        grid_spec=pltpu.PrefetchScalarGridSpec(
            num_scalar_prefetch=0,
            grid=(grid_len,),
            in_specs=[x_spec, w1_spec, wh_spec, w7_spec],
            out_specs=o_spec,
        ),
        compiler_params=pltpu.CompilerParams(
            dimension_semantics=("parallel",),
            vmem_limit_bytes=vmem_limit,
        ),
        cost_estimate=cost,
    )(x_p, w1_p, wh_p, w7_p)

    return out_padded[:B, :out_size]


def init_params(key, in_size, out_size, hidden=HIDDEN):
    """Deterministic synthetic parameter init (Kaiming-uniform-ish, like torch)."""
    dims = [in_size] + [hidden] * 6 + [out_size]
    params = []
    for i in range(7):
        key, kw, kb = jax.random.split(key, 3)
        fan_in, fan_out = dims[i], dims[i + 1]
        bound = 1.0 / jnp.sqrt(fan_in)
        w = jax.random.uniform(kw, (fan_in, fan_out), jnp.float32, -bound, bound)
        b = jax.random.uniform(kb, (1, fan_out), jnp.float32, -bound, bound)
        params.append((w, b))
    return params


def _reference_forward(x, params):
    """Pure-JAX f32 reference matching the PyTorch module."""
    h = x
    for (w, b) in params[:-1]:
        h = jnp.maximum(h @ w + b, 0.0)
    w, b = params[-1]
    return jax.nn.sigmoid(h @ w + b)


# TODO(synk): the module's Adam optimizer / loss `step()` is training-only and
# has no forward-pass Pallas equivalent; only forward() is implemented here.

if __name__ == "__main__":
    key = jax.random.PRNGKey(0)
    k_x, k_p = jax.random.split(key)

    B, in_size, out_size = 16, 32, 4
    x = jax.random.normal(k_x, (B, in_size), jnp.float32)
    params = init_params(k_p, in_size, out_size)

    fwd = jax.jit(neuralnet_forward)
    y = fwd(x, params)
    jax.block_until_ready(y)

    y_ref = _reference_forward(x, params)
    assert y.shape == (B, out_size), y.shape
    # bf16 matmul operands / activations (f32 accumulate) -> small deviation
    # from the f32 reference.
    assert jnp.allclose(y, y_ref, atol=2e-2, rtol=2e-2), (
        float(jnp.max(jnp.abs(y - y_ref))))

    print("KERNEL_OK")
</pallas_src>

<mosaic_0001>
module attributes {stable_mosaic.version = 11 : i64} {
  func.func @_mlp_kernel(%arg0: i32, %arg1: memref<16x128xf32, #tpu.memory_space<vmem>>, %arg2: memref<128x384xbf16, #tpu.memory_space<vmem>>, %arg3: memref<5x384x384xbf16, #tpu.memory_space<vmem>>, %arg4: memref<384x128xbf16, #tpu.memory_space<vmem>>, %arg5: memref<16x128xf32, #tpu.memory_space<vmem>>) attributes {dimension_semantics = [#tpu.dimension_semantics<parallel>], iteration_bounds = array<i64: 1>, scalar_prefetch = 0 : i64, scratch_operands = 0 : i64, tpu.core_type = #tpu.core_type<tc>, window_params = [{transform_indices = @transform_0, window_bounds = array<i64: 16, 128>}, {pipeline_mode = #tpu.pipeline_mode<synchronous>, transform_indices = @transform_1, window_bounds = array<i64: 128, 384>}, {pipeline_mode = #tpu.pipeline_mode<synchronous>, transform_indices = @transform_2, window_bounds = array<i64: 5, 384, 384>}, {pipeline_mode = #tpu.pipeline_mode<synchronous>, transform_indices = @transform_3, window_bounds = array<i64: 384, 128>}, {transform_indices = @transform_4, window_bounds = array<i64: 16, 128>}]} {
    %c0 = arith.constant 0 : index
    %c0_0 = arith.constant 0 : index
    %0 = vector.load %arg2[%c0, %c0_0] : memref<128x384xbf16, #tpu.memory_space<vmem>>, vector<128x384xbf16>
    %c0_1 = arith.constant 0 : index
    %c0_2 = arith.constant 0 : index
    %1 = vector.load %arg4[%c0_1, %c0_2] : memref<384x128xbf16, #tpu.memory_space<vmem>>, vector<384x128xbf16>
    %c0_3 = arith.constant 0 : index
    %c0_4 = arith.constant 0 : index
    %2 = vector.load %arg1[%c0_3, %c0_4] : memref<16x128xf32, #tpu.memory_space<vmem>>, vector<16x128xf32>
    %3 = arith.truncf %2 : vector<16x128xf32> to vector<16x128xbf16>
    %cst = arith.constant dense<0.000000e+00> : vector<16x384xf32>
    %4 = tpu.matmul %3, %0, %cst {dimension_numbers = #tpu.dot_dimension_numbers<[1], [0], [0], [1], [0, 0, 1, 1], [], []>} : vector<16x128xbf16>, vector<128x384xbf16>, vector<16x384xf32> -> vector<16x384xf32>
    %cst_5 = arith.constant 0.000000e+00 : f32
    %5 = vector.broadcast %cst_5 : f32 to vector<16x384xf32>
    %6 = arith.maximumf %4, %5 : vector<16x384xf32>
    %7 = arith.truncf %6 : vector<16x384xf32> to vector<16x384xbf16>
    %c0_6 = arith.constant 0 : index
    %c0_7 = arith.constant 0 : index
    %c0_8 = arith.constant 0 : index
    %8 = vector.load %arg3[%c0_6, %c0_7, %c0_8] : memref<5x384x384xbf16, #tpu.memory_space<vmem>>, vector<1x384x384xbf16>
    %9 = vector.shape_cast %8 : vector<1x384x384xbf16> to vector<384x384xbf16>
    %cst_9 = arith.constant dense<0.000000e+00> : vector<16x384xf32>
    %10 = tpu.matmul %7, %9, %cst_9 {dimension_numbers = #tpu.dot_dimension_numbers<[1], [0], [0], [1], [0, 0, 1, 1], [], []>} : vector<16x384xbf16>, vector<384x384xbf16>, vector<16x384xf32> -> vector<16x384xf32>
    %cst_10 = arith.constant 0.000000e+00 : f32
    %11 = vector.broadcast %cst_10 : f32 to vector<16x384xf32>
    %12 = arith.maximumf %10, %11 : vector<16x384xf32>
    %13 = arith.truncf %12 : vector<16x384xf32> to vector<16x384xbf16>
    %c1 = arith.constant 1 : index
    %c0_11 = arith.constant 0 : index
    %c0_12 = arith.constant 0 : index
    %14 = vector.load %arg3[%c1, %c0_11, %c0_12] : memref<5x384x384xbf16, #tpu.memory_space<vmem>>, vector<1x384x384xbf16>
    %15 = vector.shape_cast %14 : vector<1x384x384xbf16> to vector<384x384xbf16>
    %cst_13 = arith.constant dense<0.000000e+00> : vector<16x384xf32>
    %16 = tpu.matmul %13, %15, %cst_13 {dimension_numbers = #tpu.dot_dimension_numbers<[1], [0], [0], [1], [0, 0, 1, 1], [], []>} : vector<16x384xbf16>, vector<384x384xbf16>, vector<16x384xf32> -> vector<16x384xf32>
    %cst_14 = arith.constant 0.000000e+00 : f32
    %17 = vector.broadcast %cst_14 : f32 to vector<16x384xf32>
    %18 = arith.maximumf %16, %17 : vector<16x384xf32>
    %19 = arith.truncf %18 : vector<16x384xf32> to vector<16x384xbf16>
    %c2 = arith.constant 2 : index
    %c0_15 = arith.constant 0 : index
    %c0_16 = arith.constant 0 : index
    %20 = vector.load %arg3[%c2, %c0_15, %c0_16] : memref<5x384x384xbf16, #tpu.memory_space<vmem>>, vector<1x384x384xbf16>
    %21 = vector.shape_cast %20 : vector<1x384x384xbf16> to vector<384x384xbf16>
    %cst_17 = arith.constant dense<0.000000e+00> : vector<16x384xf32>
    %22 = tpu.matmul %19, %21, %cst_17 {dimension_numbers = #tpu.dot_dimension_numbers<[1], [0], [0], [1], [0, 0, 1, 1], [], []>} : vector<16x384xbf16>, vector<384x384xbf16>, vector<16x384xf32> -> vector<16x384xf32>
    %cst_18 = arith.constant 0.000000e+00 : f32
    %23 = vector.broadcast %cst_18 : f32 to vector<16x384xf32>
    %24 = arith.maximumf %22, %23 : vector<16x384xf32>
    %25 = arith.truncf %24 : vector<16x384xf32> to vector<16x384xbf16>
    %c3 = arith.constant 3 : index
    %c0_19 = arith.constant 0 : index
    %c0_20 = arith.constant 0 : index
    %26 = vector.load %arg3[%c3, %c0_19, %c0_20] : memref<5x384x384xbf16, #tpu.memory_space<vmem>>, vector<1x384x384xbf16>
    %27 = vector.shape_cast %26 : vector<1x384x384xbf16> to vector<384x384xbf16>
    %cst_21 = arith.constant dense<0.000000e+00> : vector<16x384xf32>
    %28 = tpu.matmul %25, %27, %cst_21 {dimension_numbers = #tpu.dot_dimension_numbers<[1], [0], [0], [1], [0, 0, 1, 1], [], []>} : vector<16x384xbf16>, vector<384x384xbf16>, vector<16x384xf32> -> vector<16x384xf32>
    %cst_22 = arith.constant 0.000000e+00 : f32
    %29 = vector.broadcast %cst_22 : f32 to vector<16x384xf32>
    %30 = arith.maximumf %28, %29 : vector<16x384xf32>
    %31 = arith.truncf %30 : vector<16x384xf32> to vector<16x384xbf16>
    %c4 = arith.constant 4 : index
    %c0_23 = arith.constant 0 : index
    %c0_24 = arith.constant 0 : index
    %32 = vector.load %arg3[%c4, %c0_23, %c0_24] : memref<5x384x384xbf16, #tpu.memory_space<vmem>>, vector<1x384x384xbf16>
    %33 = vector.shape_cast %32 : vector<1x384x384xbf16> to vector<384x384xbf16>
    %cst_25 = arith.constant dense<0.000000e+00> : vector<16x384xf32>
    %34 = tpu.matmul %31, %33, %cst_25 {dimension_numbers = #tpu.dot_dimension_numbers<[1], [0], [0], [1], [0, 0, 1, 1], [], []>} : vector<16x384xbf16>, vector<384x384xbf16>, vector<16x384xf32> -> vector<16x384xf32>
    %cst_26 = arith.constant 0.000000e+00 : f32
    %35 = vector.broadcast %cst_26 : f32 to vector<16x384xf32>
    %36 = arith.maximumf %34, %35 : vector<16x384xf32>
    %37 = arith.truncf %36 : vector<16x384xf32> to vector<16x384xbf16>
    %cst_27 = arith.constant dense<0.000000e+00> : vector<16x128xf32>
    %38 = tpu.matmul %37, %1, %cst_27 {dimension_numbers = #tpu.dot_dimension_numbers<[1], [0], [0], [1], [0, 0, 1, 1], [], []>} : vector<16x384xbf16>, vector<384x128xbf16>, vector<16x128xf32> -> vector<16x128xf32>
    %39 = arith.negf %38 : vector<16x128xf32>
    %40 = math.exp %39 : vector<16x128xf32>
    %cst_28 = arith.constant 1.000000e+00 : f32
    %41 = vector.broadcast %cst_28 : f32 to vector<16x128xf32>
    %42 = arith.addf %41, %40 : vector<16x128xf32>
    %43 = arith.divf %41, %42 : vector<16x128xf32>
    %c0_29 = arith.constant 0 : index
    %c0_30 = arith.constant 0 : index
    %44 = vector.load %arg5[%c0_29, %c0_30] : memref<16x128xf32, #tpu.memory_space<vmem>>, vector<16x128xf32>
    tpu.vector_store %arg5[%c0_29, %c0_30], %43 {strides = array<i32>} : memref<16x128xf32, #tpu.memory_space<vmem>>, vector<16x128xf32>,
    return
  }
  func.func @transform_0(%arg0: i32) -> (i32, i32) {
    %c0_i32 = arith.constant 0 : i32
    %c0_i32_0 = arith.constant 0 : i32
    return %arg0, %c0_i32 : i32, i32
  }
  func.func @transform_1(%arg0: i32) -> (i32, i32) {
    %c0_i32 = arith.constant 0 : i32
    %c0_i32_0 = arith.constant 0 : i32
    %c0_i32_1 = arith.constant 0 : i32
    return %c0_i32, %c0_i32_0 : i32, i32
  }
  func.func @transform_2(%arg0: i32) -> (i32, i32, i32) {
    %c0_i32 = arith.constant 0 : i32
    %c0_i32_0 = arith.constant 0 : i32
    %c0_i32_1 = arith.constant 0 : i32
    %c0_i32_2 = arith.constant 0 : i32
    return %c0_i32, %c0_i32_0, %c0_i32_1 : i32, i32, i32
  }
  func.func @transform_3(%arg0: i32) -> (i32, i32) {
    %c0_i32 = arith.constant 0 : i32
    %c0_i32_0 = arith.constant 0 : i32
    %c0_i32_1 = arith.constant 0 : i32
    return %c0_i32, %c0_i32_0 : i32, i32
  }
  func.func @transform_4(%arg0: i32) -> (i32, i32) {
    %c0_i32 = arith.constant 0 : i32
    %c0_i32_0 = arith.constant 0 : i32
    return %arg0, %c0_i32 : i32, i32
  }
}

</mosaic_0001>

<bundles_post_ra>
// kernel: neuralnet_forward.1
= control target key start
LH: loop header
LB: loop body
LE: loop exit
PB: predicated region body
PF: predicated region fallthrough
CT: control target
= control target key end

     0   :  { %v5551_v1 = vmov 0.0   ;;  %v5552_v2 = vmov 0   ;;  %vm5553_vm0 = vmmov 0   ;;  %s6891_s1 = inlined_call_operand.vmem [shape: bf16[128,384], index: 1, kind: input, shape index: {}]   ;;  %s6892_s2 = inlined_call_operand.vmem [shape: bf16[5,384,384], index: 2, kind: input, shape index: {}]   ;;  %s6893_s0 = inlined_call_operand.vmem [shape: f32[16,128], index: 0, kind: input, shape index: {}]   ;;  %s6894_s3 = inlined_call_operand.vmem [shape: bf16[384,128], index: 3, kind: input, shape index: {}]   ;;  %s6895_s4 = inlined_call_operand.vmem [shape: f32[16,128], index: 4, kind: output, shape index: {}]  }
   0x1   :  { %v5007_v0 = vld [vmem:[%s6891_s1 + $0x4] ss:$12 sps:$4 sm:$0xff]   ;;  %4844 = vmatprep.subr.bf16.mxu1 %v5551_v1  ;;  %261 = vmatprep.mubr.bf16.mxu0 %v5552_v2  ;;  %v5009_v3 = vld [vmem:[%s6891_s1] ss:$12 sps:$4 sm:$0xff]   ;;  %v5010_v4 = vld [vmem:[%s6891_s1 + $0x1c] ss:$12 sps:$4 sm:$0xff]  }
   0x2   :  { %4860 = vmatprep.mubr.msk.bf16.mxu1 %vm5553_vm0, %v5551_v1  ;;  %229 = vmatprep.subr.bf16.mxu0 %v5007_v0  ;;  %v5012_v5 = vld [vmem:[%s6891_s1 + $0x18] ss:$12 sps:$4 sm:$0xff]   ;;  %v5013_v6 = vld [vmem:[%s6891_s1 + $0x34] ss:$12 sps:$4 sm:$0xff]   ;;  %v5015_v7 = vld [vmem:[%s6891_s1 + $0x30] ss:$12 sps:$4 sm:$0xff]  }
   0x3   :  { %230 = vmatpush1.bf16.msra.mxu0 %v5009_v3  ;;  %v5016_v8 = vld [vmem:[%s6891_s1 + $0x4c] ss:$12 sps:$4 sm:$0xff]   ;;  %v5018_v9 = vld [vmem:[%s6891_s1 + $0x48] ss:$12 sps:$4 sm:$0xff]   ;;  %v5019_v11 = vld [vmem:[%s6891_s1 + $0x64] ss:$12 sps:$4 sm:$0xff]  }
   0x4   :  { %231 = vmatprep.subr.bf16.mxu0 %v5010_v4  ;;  %v5031_v10 = vld [vmem:[%s6891_s1 + $0x8] ss:$12 sps:$4 sm:$0xff]   ;;  %v5032_v12 = vld [vmem:[%s6891_s1 + $0x20] ss:$12 sps:$4 sm:$0xff]   ;;  %v5033_v15 = vld [vmem:[%s6891_s1 + $0x38] ss:$12 sps:$4 sm:$0xff]  }
   0x5   :  { %4845 = vmatpush3.bf16.msra.mxu1 %v5031_v10  ;;  %v5021_v13 = vld [vmem:[%s6891_s1 + $0x60] ss:$12 sps:$4 sm:$0xff]   ;;  %v5022_v14 = vld [vmem:[%s6891_s1 + $0x7c] ss:$12 sps:$4 sm:$0xff]   ;;  %v5024_v16 = vld [vmem:[%s6891_s1 + $0x78] ss:$12 sps:$4 sm:$0xff]  }
   0x6   :  { %4846 = vmatprep.subr.bf16.mxu1 %v5551_v1  ;;  %v5025_v17 = vld [vmem:[%s6891_s1 + $0x94] ss:$12 sps:$4 sm:$0xff]   ;;  %v5034_v18 = vld [vmem:[%s6891_s1 + $0x50] ss:$12 sps:$4 sm:$0xff]   ;;  %v5028_v20 = vld [vmem:[%s6891_s1 + $0xac] ss:$12 sps:$4 sm:$0xff]  }
   0x7   :  { %232 = vmatpush1.bf16.msra.mxu0 %v5012_v5  ;;  %v5027_v19 = vld [vmem:[%s6891_s1 + $0x90] ss:$12 sps:$4 sm:$0xff]   ;;  %v5030_v21 = vld [vmem:[%s6891_s1 + $0xa8] ss:$12 sps:$4 sm:$0xff]   ;;  %v98_v23 = vld [vmem:[%s6893_s0] sm:$0xff] }
   0x8   :  { %233 = vmatprep.subr.bf16.mxu0 %v5013_v6  ;;  %v5035_v22 = vld [vmem:[%s6891_s1 + $0x68] ss:$12 sps:$4 sm:$0xff]   ;;  %v5041_v25 = vld [vmem:[%s6892_s2 + $0x4] ss:$12 sps:$4 sm:$0xff]   ;;  %v5036_v26 = vld [vmem:[%s6891_s1 + $0x80] ss:$12 sps:$4 sm:$0xff]  }
   0x9   :  { %4847 = vmatpush3.bf16.msra.mxu1 %v5032_v12  ;;  %v99_v24 = vld [vmem:[%s6893_s0 + $0x8] sm:$0xff]  ;;  %v5037_v30 = vld [vmem:[%s6891_s1 + $0x98] ss:$12 sps:$4 sm:$0xff]   ;;  %v5047_v32 = vld [vmem:[%s6892_s2 + $0x34] ss:$12 sps:$4 sm:$0xff]  }
   0xa   :  { %4848 = vmatprep.subr.bf16.mxu1 %v5551_v1  ;;  %v100_v27 = vpack.c.bf16 %v99_v24, %v98_v23  ;;  %v5039_v28 = vld [vmem:[%s6892_s2] ss:$12 sps:$4 sm:$0xff]   ;;  %v5044_v29 = vld [vmem:[%s6892_s2 + $0x1c] ss:$12 sps:$4 sm:$0xff]   ;;  %v5042_v31 = vld [vmem:[%s6892_s2 + $0x18] ss:$12 sps:$4 sm:$0xff]  }
   0xb   :  { %234 = vmatpush1.bf16.msra.mxu0 %v5015_v7  ;;  %v5038_v33 = vld [vmem:[%s6891_s1 + $0xb0] ss:$12 sps:$4 sm:$0xff]   ;;  %v5066_v34 = vld [vmem:[%s6892_s2 + $0xc8] ss:$12 sps:$4 sm:$0xff]   ;;  %v5050_v36 = vld [vmem:[%s6892_s2 + $0x4c] ss:$12 sps:$4 sm:$0xff]  }
   0xc   :  { %235 = vmatprep.subr.bf16.mxu0 %v5016_v8  ;;  %v5045_v35 = vld [vmem:[%s6892_s2 + $0x30] ss:$12 sps:$4 sm:$0xff]   ;;  %v5067_v37 = vld [vmem:[%s6892_s2 + $0x8] ss:$12 sps:$4 sm:$0xff]   ;;  %v5071_v38 = vld [vmem:[%s6892_s2 + $0xe0] ss:$12 sps:$4 sm:$0xff]  }
   0xd   :  { %4849 = vmatpush3.bf16.msra.mxu1 %v5033_v15  ;;  %v5048_v39 = vld [vmem:[%s6892_s2 + $0x48] ss:$12 sps:$4 sm:$0xff]   ;;  %v5053_v40 = vld [vmem:[%s6892_s2 + $0x64] ss:$12 sps:$4 sm:$0xff]   ;;  %v5072_v41 = vld [vmem:[%s6892_s2 + $0x20] ss:$12 sps:$4 sm:$0xff]  }
   0xe   :  { %4850 = vmatprep.subr.bf16.mxu1 %v5551_v1  ;;  %v5076_v42 = vld [vmem:[%s6892_s2 + $0xf8] ss:$12 sps:$4 sm:$0xff]   ;;  %v5051_v43 = vld [vmem:[%s6892_s2 + $0x60] ss:$12 sps:$4 sm:$0xff]   ;;  %v5056_v44 = vld [vmem:[%s6892_s2 + $0x7c] ss:$12 sps:$4 sm:$0xff]  }
   0xf   :  { %236 = vmatpush1.bf16.msra.mxu0 %v5018_v9  ;;  %v5077_v45 = vld [vmem:[%s6892_s2 + $0x38] ss:$12 sps:$4 sm:$0xff]   ;;  %v5081_v47 = vld [vmem:[%s6892_s2 + $0x110] ss:$12 sps:$4 sm:$0xff]   ;;  %v5059_v48 = vld [vmem:[%s6892_s2 + $0x94] ss:$12 sps:$4 sm:$0xff]  }
  0x10   :  { %237 = vmatprep.subr.bf16.mxu0 %v5019_v11  ;;  %v5054_v46 = vld [vmem:[%s6892_s2 + $0x78] ss:$12 sps:$4 sm:$0xff]   ;;  %v5082_v49 = vld [vmem:[%s6892_s2 + $0x50] ss:$12 sps:$4 sm:$0xff]   ;;  %v5086_v50 = vld [vmem:[%s6892_s2 + $0x128] ss:$12 sps:$4 sm:$0xff]  }
  0x11   :  { %4851 = vmatpush3.bf16.msra.mxu1 %v5034_v18  ;;  %v5057_v51 = vld [vmem:[%s6892_s2 + $0x90] ss:$12 sps:$4 sm:$0xff]   ;;  %v5062_v52 = vld [vmem:[%s6892_s2 + $0xac] ss:$12 sps:$4 sm:$0xff]   ;;  %v5087_v53 = vld [vmem:[%s6892_s2 + $0x68] ss:$12 sps:$4 sm:$0xff]  }
  0x12   :  { %4852 = vmatprep.subr.bf16.mxu1 %v5551_v1  ;;  %v5091_v54 = vld [vmem:[%s6892_s2 + $0x140] ss:$12 sps:$4 sm:$0xff]   ;;  %v5060_v55 = vld [vmem:[%s6892_s2 + $0xa8] ss:$12 sps:$4 sm:$0xff]   ;;  %v5065_v56 = vld [vmem:[%s6892_s2 + $0xc4] ss:$12 sps:$4 sm:$0xff]  }
  0x13   :  { %238 = vmatpush1.bf16.msra.mxu0 %v5021_v13  ;;  %v5092_v57 = vld [vmem:[%s6892_s2 + $0x80] ss:$12 sps:$4 sm:$0xff]   ;;  %v5070_v59 = vld [vmem:[%s6892_s2 + $0xdc] ss:$12 sps:$4 sm:$0xff]   ;;  %v5068_v60 = vld [vmem:[%s6892_s2 + $0xd8] ss:$12 sps:$4 sm:$0xff]  }
  0x14   :  { %239 = vmatprep.subr.bf16.mxu0 %v5022_v14  ;;  %v5063_v58 = vld [vmem:[%s6892_s2 + $0xc0] ss:$12 sps:$4 sm:$0xff]   ;;  %v5073_v62 = vld [vmem:[%s6892_s2 + $0xf0] ss:$12 sps:$4 sm:$0xff]   ;;  %v5078_v0 = vld [vmem:[%s6892_s2 + $0x108] ss:$12 sps:$4 sm:$0xff]  }
  0x15   :  { %4853 = vmatpush3.bf16.msra.mxu1 %v5035_v22  ;;  %v5075_v61 = vld [vmem:[%s6892_s2 + $0xf4] ss:$12 sps:$4 sm:$0xff]   ;;  %v5080_v63 = vld [vmem:[%s6892_s2 + $0x10c] ss:$12 sps:$4 sm:$0xff]   ;;  %v5085_v3 = vld [vmem:[%s6892_s2 + $0x124] ss:$12 sps:$4 sm:$0xff]  }
  0x16   :  { %4854 = vmatprep.subr.bf16.mxu1 %v5551_v1  ;;  %v5083_v4 = vld [vmem:[%s6892_s2 + $0x120] ss:$12 sps:$4 sm:$0xff]   ;;  %v5090_v5 = vld [vmem:[%s6892_s2 + $0x13c] ss:$12 sps:$4 sm:$0xff]   ;;  %v5088_v6 = vld [vmem:[%s6892_s2 + $0x138] ss:$12 sps:$4 sm:$0xff]  }
  0x17   :  { %240 = vmatpush1.bf16.msra.mxu0 %v5024_v16  ;;  %v5095_v7 = vld [vmem:[%s6892_s2 + $0x154] ss:$12 sps:$4 sm:$0xff]   ;;  %v5096_v8 = vld [vmem:[%s6892_s2 + $0x158] ss:$12 sps:$4 sm:$0xff]   ;;  %v5093_v9 = vld [vmem:[%s6892_s2 + $0x150] ss:$12 sps:$4 sm:$0xff]  }
  0x18   :  { %241 = vmatprep.subr.bf16.mxu0 %v5025_v17  ;;  %v5097_v10 = vld [vmem:[%s6892_s2 + $0x98] ss:$12 sps:$4 sm:$0xff]   ;;  %v5101_v12 = vld [vmem:[%s6892_s2 + $0x170] ss:$12 sps:$4 sm:$0xff]   ;;  %v5098_v13 = vld [vmem:[%s6892_s2 + $0x168] ss:$12 sps:$4 sm:$0xff]  }
  0x19   :  { %4855 = vmatpush3.bf16.msra.mxu1 %v5036_v26  ;;  %v5100_v11 = vld [vmem:[%s6892_s2 + $0x16c] ss:$12 sps:$4 sm:$0xff]   ;;  %v5102_v14 = vld [vmem:[%s6892_s2 + $0xb0] ss:$12 sps:$4 sm:$0xff]  }
  0x1a   :  { %4856 = vmatprep.subr.bf16.mxu1 %v5551_v1  ;;  %v5105_v15 = vld [vmem:[%s6892_s2 + $0x184] ss:$12 sps:$4 sm:$0xff]   ;;  %v5103_v26 = vld [vmem:[%s6892_s2 + $0x180] ss:$12 sps:$4 sm:$0xff]  }
  0x1b   :  { %242 = vmatpush1.bf16.msra.mxu0 %v5027_v19 }
  0x1c   :  { %243 = vmatprep.subr.bf16.mxu0 %v5028_v20 }
  0x1d   :  { %4857 = vmatpush3.bf16.msra.mxu1 %v5037_v30  ;;  %v5110_v30 = vld [vmem:[%s6892_s2 + $0x1a0] ss:$12 sps:$4 sm:$0xff]  }
  0x1e   :  { %4858 = vmatprep.subr.bf16.mxu1 %v5551_v1 }
  0x1f   :  { %244 = vmatpush1.bf16.msra.mxu0 %v5030_v21 }
  0x20   :  { %802 = vmatprep.subr.bf16.mxu0 %v5041_v25 }
  0x21   :  { %4859 = vmatpush3.bf16.msra.mxu1 %v5038_v33 }
  0x22   :  { %262 = vmatmul.mubr.bf16.vlgmr.msra.gmra.mrb[0].mxu0 %v100_v27  ;;  %4658 = vmatprep.subr.bf16.mxu1 %v5066_v34 }
  0x23   :  { %803 = vmatpush1.bf16.msra.mxu0 %v5039_v28  ;;  %v5109_v28 = vld [vmem:[%s6892_s2 + $0x19c] ss:$12 sps:$4 sm:$0xff]  }
  0x24   :  { %804 = vmatprep.subr.bf16.mxu0 %v5044_v29  ;;  %4861 = vmatmul.mubr.bf16.vlgmr.msra.gmra.mrb[0].mxu1 %v100_v27  ;;  %v5106_v27 = vld [vmem:[%s6892_s2 + $0x188] ss:$12 sps:$4 sm:$0xff]   ;;  %v5107_v29 = vld [vmem:[%s6892_s2 + $0x198] ss:$12 sps:$4 sm:$0xff]  }
  0x25   :  { %4659 = vmatpush3.bf16.msra.mxu1 %v5067_v37 }
  0x26   :  { %4660 = vmatprep.subr.bf16.mxu1 %v5071_v38  ;;  %v5111_v38 = vld [vmem:[%s6892_s2 + $0x1b0] ss:$12 sps:$4 sm:$0xff]  }
  0x27   :  { %805 = vmatpush1.bf16.msra.mxu0 %v5042_v31 }
  0x28   :  { %806 = vmatprep.subr.bf16.mxu0 %v5047_v32  ;;  %v5113_v32 = vld [vmem:[%s6892_s2 + $0x1b4] ss:$12 sps:$4 sm:$0xff]  }
  0x29   :  { %4661 = vmatpush3.bf16.msra.mxu1 %v5072_v41 }
  0x2a   :  { %4662 = vmatprep.subr.bf16.mxu1 %v5076_v42  ;;  %v5115_v42 = vld [vmem:[%s6892_s2 + $0x1c8] ss:$12 sps:$4 sm:$0xff]  }
  0x2b   :  { %807 = vmatpush1.bf16.msra.mxu0 %v5045_v35 }
  0x2c   :  { %808 = vmatprep.subr.bf16.mxu0 %v5050_v36 }
  0x2d   :  { %4663 = vmatpush3.bf16.msra.mxu1 %v5077_v45  ;;  %v5119_v45 = vld [vmem:[%s6892_s2 + $0x1e0] ss:$12 sps:$4 sm:$0xff]  }
  0x2e   :  { %4664 = vmatprep.subr.bf16.mxu1 %v5081_v47  ;;  %v5125_v47 = vld [vmem:[%s6892_s2 + $0x1fc] ss:$12 sps:$4 sm:$0xff]  }
  0x2f   :  { %809 = vmatpush1.bf16.msra.mxu0 %v5048_v39  ;;  %v5114_v39 = vld [vmem:[%s6892_s2 + $0x1b8] ss:$12 sps:$4 sm:$0xff]  }
  0x30   :  { %810 = vmatprep.subr.bf16.mxu0 %v5053_v40  ;;  %v5117_v40 = vld [vmem:[%s6892_s2 + $0x1cc] ss:$12 sps:$4 sm:$0xff]  }
  0x31   :  { %4665 = vmatpush3.bf16.msra.mxu1 %v5082_v49  ;;  %v5126_v49 = vld [vmem:[%s6892_s2 + $0x200] ss:$12 sps:$4 sm:$0xff]  }
  0x32   :  { %4666 = vmatprep.subr.bf16.mxu1 %v5086_v50  ;;  %v5129_v50 = vld [vmem:[%s6892_s2 + $0x214] ss:$12 sps:$4 sm:$0xff]  }
  0x33   :  { %811 = vmatpush1.bf16.msra.mxu0 %v5051_v43  ;;  %v5118_v43 = vld [vmem:[%s6892_s2 + $0x1d0] ss:$12 sps:$4 sm:$0xff]  }
  0x34   :  { %812 = vmatprep.subr.bf16.mxu0 %v5056_v44  ;;  %v5121_v44 = vld [vmem:[%s6892_s2 + $0x1e4] ss:$12 sps:$4 sm:$0xff]  }
  0x35   :  { %4667 = vmatpush3.bf16.msra.mxu1 %v5087_v53  ;;  %v5133_v53 = vld [vmem:[%s6892_s2 + $0x22c] ss:$12 sps:$4 sm:$0xff]  }
  0x36   :  { %4668 = vmatprep.subr.bf16.mxu1 %v5091_v54  ;;  %v5131_v54 = vld [vmem:[%s6892_s2 + $0x228] ss:$12 sps:$4 sm:$0xff]  }
  0x37   :  { %813 = vmatpush1.bf16.msra.mxu0 %v5054_v46  ;;  %v5122_v46 = vld [vmem:[%s6892_s2 + $0x1e8] ss:$12 sps:$4 sm:$0xff]  }
  0x38   :  { %814 = vmatprep.subr.bf16.mxu0 %v5059_v48  ;;  %v5123_v48 = vld [vmem:[%s6892_s2 + $0x1f8] ss:$12 sps:$4 sm:$0xff]  }
  0x39   :  { %4669 = vmatpush3.bf16.msra.mxu1 %v5092_v57  ;;  %v5135_v57 = vld [vmem:[%s6892_s2 + $0x240] ss:$12 sps:$4 sm:$0xff]  }
  0x3a   :  { %4670 = vmatprep.subr.bf16.mxu1 %v5096_v8  ;;  %v5158_v8 = vld [vmem:[%s6892_s2 + $0x2ec] ss:$12 sps:$4 sm:$0xff]  }
  0x3b   :  { %815 = vmatpush1.bf16.msra.mxu0 %v5057_v51  ;;  %v5127_v51 = vld [vmem:[%s6892_s2 + $0x210] ss:$12 sps:$4 sm:$0xff]  }
  0x3c   :  { %816 = vmatprep.subr.bf16.mxu0 %v5062_v52  ;;  %v5130_v52 = vld [vmem:[%s6892_s2 + $0x218] ss:$12 sps:$4 sm:$0xff]  }
  0x3d   :  { %4671 = vmatpush3.bf16.msra.mxu1 %v5097_v10  ;;  %v5161_v10 = vld [vmem:[%s6892_s2 + $0x304] ss:$12 sps:$4 sm:$0xff]  }
  0x3e   :  { %4672 = vmatprep.subr.bf16.mxu1 %v5101_v12  ;;  %v5159_v12 = vld [vmem:[%s6892_s2 + $0x300] ss:$12 sps:$4 sm:$0xff]  }
  0x3f   :  { %817 = vmatpush1.bf16.msra.mxu0 %v5060_v55  ;;  %v5134_v55 = vld [vmem:[%s6892_s2 + $0x230] ss:$12 sps:$4 sm:$0xff]  }
  0x40   :  { %818 = vmatprep.subr.bf16.mxu0 %v5065_v56  ;;  %v5137_v56 = vld [vmem:[%s6892_s2 + $0x244] ss:$12 sps:$4 sm:$0xff]  }
  0x41   :  { %4673 = vmatpush3.bf16.msra.mxu1 %v5102_v14  ;;  %v5166_v14 = vld [vmem:[%s6892_s2 + $0x31c] ss:$12 sps:$4 sm:$0xff]  }
  0x42   :  { %4864 = vmatprep.subr.bf16.mxu1 %v5551_v1 }
  0x43   :  { %819 = vmatpush1.bf16.msra.mxu0 %v5063_v58  ;;  %v5140_v58 = vld [vmem:[%s6892_s2 + $0x25c] ss:$12 sps:$4 sm:$0xff]  }
  0x44   :  { %820 = vmatprep.subr.bf16.mxu0 %v5070_v59  ;;  %v5138_v59 = vld [vmem:[%s6892_s2 + $0x258] ss:$12 sps:$4 sm:$0xff]  }
  0x47   :  { %821 = vmatpush1.bf16.msra.mxu0 %v5068_v60  ;;  %v5143_v60 = vld [vmem:[%s6892_s2 + $0x274] ss:$12 sps:$4 sm:$0xff]  }
  0x48   :  { %822 = vmatprep.subr.bf16.mxu0 %v5075_v61  ;;  %v5141_v61 = vld [vmem:[%s6892_s2 + $0x270] ss:$12 sps:$4 sm:$0xff]  }
  0x4b   :  { %823 = vmatpush1.bf16.msra.mxu0 %v5073_v62  ;;  %v5146_v62 = vld [vmem:[%s6892_s2 + $0x28c] ss:$12 sps:$4 sm:$0xff]  }
  0x4c   :  { %824 = vmatprep.subr.bf16.mxu0 %v5080_v63  ;;  %v5144_v63 = vld [vmem:[%s6892_s2 + $0x288] ss:$12 sps:$4 sm:$0xff]  }
  0x4f   :  { %825 = vmatpush1.bf16.msra.mxu0 %v5078_v0  ;;  %v5149_v0 = vld [vmem:[%s6892_s2 + $0x2a4] ss:$12 sps:$4 sm:$0xff]  }
  0x50   :  { %826 = vmatprep.subr.bf16.mxu0 %v5085_v3  ;;  %v5147_v3 = vld [vmem:[%s6892_s2 + $0x2a0] ss:$12 sps:$4 sm:$0xff]  }
  0x53   :  { %827 = vmatpush1.bf16.msra.mxu0 %v5083_v4  ;;  %v5152_v4 = vld [vmem:[%s6892_s2 + $0x2bc] ss:$12 sps:$4 sm:$0xff]  }
  0x54   :  { %828 = vmatprep.subr.bf16.mxu0 %v5090_v5  ;;  %v5150_v5 = vld [vmem:[%s6892_s2 + $0x2b8] ss:$12 sps:$4 sm:$0xff]  }
  0x57   :  { %829 = vmatpush1.bf16.msra.mxu0 %v5088_v6  ;;  %v5155_v6 = vld [vmem:[%s6892_s2 + $0x2d4] ss:$12 sps:$4 sm:$0xff]  }
  0x58   :  { %830 = vmatprep.subr.bf16.mxu0 %v5095_v7  ;;  %v5153_v7 = vld [vmem:[%s6892_s2 + $0x2d0] ss:$12 sps:$4 sm:$0xff]  }
  0x5b   :  { %831 = vmatpush1.bf16.msra.mxu0 %v5093_v9  ;;  %v5156_v9 = vld [vmem:[%s6892_s2 + $0x2e8] ss:$12 sps:$4 sm:$0xff]  }
  0x5c   :  { %832 = vmatprep.subr.bf16.mxu0 %v5100_v11  ;;  %v5162_v11 = vld [vmem:[%s6892_s2 + $0x308] ss:$12 sps:$4 sm:$0xff]  }
  0x5f   :  { %833 = vmatpush1.bf16.msra.mxu0 %v5098_v13  ;;  %v5163_v13 = vld [vmem:[%s6892_s2 + $0x248] ss:$12 sps:$4 sm:$0xff]  }
  0x60   :  { %845 = vmatprep.subr.bf16.mxu0 %v5105_v15  ;;  %v5167_v15 = vld [vmem:[%s6892_s2 + $0x320] ss:$12 sps:$4 sm:$0xff]  }
  0xf5   :  { %v263_v16 = vpop.f32.mrb[0].mxu0 }
  0xf6   :  { %v265_v17 = vpop.f32.mrb[1].mxu0  ;;  %v313_v19 = vmax.f32 %v263_v16, 0.0  ;;  %v5168_v16 = vld [vmem:[%s6892_s2 + $0x260] ss:$12 sps:$4 sm:$0xff]  }
  0xf7   :  { %v267_v18 = vpop.f32.mrb[2].mxu0  ;;  %v314_v22 = vmax.f32 %v265_v17, 0.0  ;;  %v306_v31 = vpop.f32.mrb[0].mxu1  ;;  %v5172_v17 = vld [vmem:[%s6892_s2 + $0x338] ss:$12 sps:$4 sm:$0xff]  }
  0xf8   :  { %v316_v20 = vmax.f32 %v267_v18, 0.0  ;;  %v269_v21 = vpop.f32.mrb[3].mxu0  ;;  %v315_v33 = vmax.f32 %v306_v31, 0.0  ;;  %v4862_v34 = vpop.f32.mrb[1].mxu1  ;;  %v5164_v18 = vld [vmem:[%s6892_s2 + $0x318] ss:$12 sps:$4 sm:$0xff]  }
  0xf9   :  { %v317_v23 = vmax.f32 %v269_v21, 0.0  ;;  %v309_v35 = vpop.f32.mrb[2].mxu1  ;;  %v5177_v21 = vld [vmem:[%s6892_s2 + $0x350] ss:$12 sps:$4 sm:$0xff]   ;;  %v5191_v34 = vld [vmem:[%s6892_s2 + $0x394] ss:$12 sps:$4 sm:$0xff]  }
  0xfa   :  { %v319_v24 = vpack.c.bf16 %v316_v20, %v313_v19  ;;  %v318_v36 = vmax.f32 %v309_v35, 0.0  ;;  %v4863_v37 = vpop.f32.mrb[3].mxu1  ;;  %v5171_v19 = vld [vmem:[%s6892_s2 + $0x334] ss:$12 sps:$4 sm:$0xff]   ;;  %v5173_v20 = vld [vmem:[%s6892_s2 + $0x278] ss:$12 sps:$4 sm:$0xff]  }
  0xfb   :  { %v320_v25 = vpack.c.bf16 %v317_v23, %v314_v22  ;;  %v5169_v22 = vld [vmem:[%s6892_s2 + $0x330] ss:$12 sps:$4 sm:$0xff]   ;;  %v5176_v23 = vld [vmem:[%s6892_s2 + $0x34c] ss:$12 sps:$4 sm:$0xff]  }
  0xfc   :  { %v321_v41 = vpack.c.bf16 %v318_v36, %v315_v33  ;;  %v5186_v31 = vld [vmem:[%s6892_s2 + $0x37c] ss:$12 sps:$4 sm:$0xff]   ;;  %v5184_v33 = vld [vmem:[%s6892_s2 + $0x378] ss:$12 sps:$4 sm:$0xff]  }
  0xfd   :  { %834 = vmatprep.mubr.bf16.mxu0 %v320_v25  ;;  %920 = vmatprep.mubr.bf16.mxu1 %v320_v25  ;;  %v5182_v25 = vld [vmem:[%s6892_s2 + $0x368] ss:$12 sps:$4 sm:$0xff]   ;;  %v5192_v35 = vld [vmem:[%s6892_s2 + $0x398] ss:$12 sps:$4 sm:$0xff]   ;;  %v5189_v36 = vld [vmem:[%s6892_s2 + $0x390] ss:$12 sps:$4 sm:$0xff]  }
  0xfe   :  { %835 = vmatmul.mubr.bf16.vlgmr.msra.gmra.mrb[4].mxu0 %v319_v24  ;;  %921 = vmatmul.mubr.bf16.vlgmr.msra.gmra.mrb[4].mxu1 %v319_v24  ;;  %v5178_v24 = vld [vmem:[%s6892_s2 + $0x290] ss:$12 sps:$4 sm:$0xff]   ;;  %v5193_v37 = vld [vmem:[%s6892_s2 + $0x2d8] ss:$12 sps:$4 sm:$0xff]  }
  0xff   :  { %846 = vmatpush1.bf16.msra.mxu0 %v5103_v26  ;;  %4865 = vmatpush3.bf16.msra.mxu1 %v5106_v27  ;;  %v5174_v26 = vld [vmem:[%s6892_s2 + $0x348] ss:$12 sps:$4 sm:$0xff]   ;;  %v5181_v27 = vld [vmem:[%s6892_s2 + $0x364] ss:$12 sps:$4 sm:$0xff]  }
 0x100   :  { %847 = vmatprep.subr.bf16.mxu0 %v5109_v28  ;;  %4866 = vmatprep.subr.bf16.mxu1 %v5551_v1  ;;  %v5183_v28 = vld [vmem:[%s6892_s2 + $0x2a8] ss:$12 sps:$4 sm:$0xff]  }
 0x101   :  { %877 = vmatprep.mubr.bf16.mxu0 %v5552_v2  ;;  %4880 = vmatprep.mubr.msk.bf16.mxu1 %vm5553_vm0, %v5551_v1 }
 0x103   :  { %848 = vmatpush1.bf16.msra.mxu0 %v5107_v29  ;;  %4867 = vmatpush3.bf16.msra.mxu1 %v5110_v30  ;;  %v5187_v29 = vld [vmem:[%s6892_s2 + $0x380] ss:$12 sps:$4 sm:$0xff]  }
 0x104   :  { %849 = vmatprep.subr.bf16.mxu0 %v5113_v32  ;;  %4868 = vmatprep.subr.bf16.mxu1 %v5551_v1  ;;  %v5179_v30 = vld [vmem:[%s6892_s2 + $0x360] ss:$12 sps:$4 sm:$0xff]  }
 0x105   :  { %v5188_v32 = vld [vmem:[%s6892_s2 + $0x2c0] ss:$12 sps:$4 sm:$0xff]  }
 0x107   :  { %850 = vmatpush1.bf16.msra.mxu0 %v5111_v38  ;;  %4869 = vmatpush3.bf16.msra.mxu1 %v5114_v39  ;;  %v5196_v38 = vld [vmem:[%s6892_s2 + $0x3ac] ss:$12 sps:$4 sm:$0xff]   ;;  %v5197_v39 = vld [vmem:[%s6892_s2 + $0x3b0] ss:$12 sps:$4 sm:$0xff]  }
 0x108   :  { %851 = vmatprep.subr.bf16.mxu0 %v5117_v40  ;;  %4870 = vmatprep.subr.bf16.mxu1 %v5551_v1  ;;  %v5194_v40 = vld [vmem:[%s6892_s2 + $0x3a8] ss:$12 sps:$4 sm:$0xff]  }
 0x10b   :  { %852 = vmatpush1.bf16.msra.mxu0 %v5115_v42  ;;  %4871 = vmatpush3.bf16.msra.mxu1 %v5118_v43  ;;  %v5201_v42 = vld [vmem:[%s6892_s2 + $0x3c4] ss:$12 sps:$4 sm:$0xff]  }
 0x10c   :  { %853 = vmatprep.subr.bf16.mxu0 %v5121_v44  ;;  %4872 = vmatprep.subr.bf16.mxu1 %v5551_v1 }
 0x10f   :  { %854 = vmatpush1.bf16.msra.mxu0 %v5119_v45  ;;  %4873 = vmatpush3.bf16.msra.mxu1 %v5122_v46 }
 0x110   :  { %855 = vmatprep.subr.bf16.mxu0 %v5125_v47  ;;  %4874 = vmatprep.subr.bf16.mxu1 %v5551_v1 }
 0x113   :  { %856 = vmatpush1.bf16.msra.mxu0 %v5123_v48  ;;  %4875 = vmatpush3.bf16.msra.mxu1 %v5126_v49 }
 0x114   :  { %857 = vmatprep.subr.bf16.mxu0 %v5129_v50  ;;  %4876 = vmatprep.subr.bf16.mxu1 %v5551_v1 }
 0x117   :  { %858 = vmatpush1.bf16.msra.mxu0 %v5127_v51  ;;  %4877 = vmatpush3.bf16.msra.mxu1 %v5130_v52 }
 0x118   :  { %859 = vmatprep.subr.bf16.mxu0 %v5133_v53  ;;  %4878 = vmatprep.subr.bf16.mxu1 %v5551_v1 }
 0x11b   :  { %860 = vmatpush1.bf16.msra.mxu0 %v5131_v54  ;;  %4879 = vmatpush3.bf16.msra.mxu1 %v5134_v55 }
 0x11c   :  { %1460 = vmatprep.subr.bf16.mxu1 %v5137_v56  ;;  %4689 = vmatprep.subr.bf16.mxu0 %v5162_v11  ;;  %v5209_v11 = vld [vmem:[%s6892_s2 + $0x3f4] ss:$12 sps:$4 sm:$0xff]  }
 0x11e   :  { %878 = vmatmul.mubr.bf16.vlgmr.msra.gmra.mrb[4].mxu0 %v321_v41  ;;  %4881 = vmatmul.mubr.bf16.vlgmr.msra.gmra.mrb[8].mxu1 %v321_v41  ;;  %v5198_v41 = vld [vmem:[%s6892_s2 + $0x2f0] ss:$12 sps:$4 sm:$0xff]  }
 0x11f   :  { %1461 = vmatpush1.bf16.msra.mxu1 %v5135_v57  ;;  %4690 = vmatpush3.bf16.msra.mxu0 %v5163_v13  ;;  %v5210_v13 = vld [vmem:[%s6892_s2 + $0x3f8] ss:$12 sps:$4 sm:$0xff]  }
 0x120   :  { %1462 = vmatprep.subr.bf16.mxu1 %v5140_v58  ;;  %4691 = vmatprep.subr.bf16.mxu0 %v5167_v15  ;;  %v5211_v15 = vld [vmem:[%s6892_s2 + $0x408] ss:$12 sps:$4 sm:$0xff]  }
 0x123   :  { %1463 = vmatpush1.bf16.msra.mxu1 %v5138_v59  ;;  %4692 = vmatpush3.bf16.msra.mxu0 %v5168_v16  ;;  %v5214_v16 = vld [vmem:[%s6892_s2 + $0x410] ss:$12 sps:$4 sm:$0xff]  }
 0x124   :  { %1464 = vmatprep.subr.bf16.mxu1 %v5143_v60  ;;  %4693 = vmatprep.subr.bf16.mxu0 %v5172_v17  ;;  %v5217_v17 = vld [vmem:[%s6892_s2 + $0x424] ss:$12 sps:$4 sm:$0xff]  }
 0x127   :  { %1465 = vmatpush1.bf16.msra.mxu1 %v5141_v61  ;;  %4694 = vmatpush3.bf16.msra.mxu0 %v5173_v20  ;;  %v5221_v20 = vld [vmem:[%s6892_s2 + $0x43c] ss:$12 sps:$4 sm:$0xff]  }
 0x128   :  { %1466 = vmatprep.subr.bf16.mxu1 %v5146_v62  ;;  %4695 = vmatprep.subr.bf16.mxu0 %v5177_v21  ;;  %v5219_v21 = vld [vmem:[%s6892_s2 + $0x438] ss:$12 sps:$4 sm:$0xff]  }
 0x12b   :  { %1467 = vmatpush1.bf16.msra.mxu1 %v5144_v63  ;;  %4696 = vmatpush3.bf16.msra.mxu0 %v5178_v24  ;;  %v5223_v24 = vld [vmem:[%s6892_s2 + $0x450] ss:$12 sps:$4 sm:$0xff]  }
 0x12c   :  { %1468 = vmatprep.subr.bf16.mxu1 %v5149_v0  ;;  %4697 = vmatprep.subr.bf16.mxu0 %v5182_v25  ;;  %v5226_v25 = vld [vmem:[%s6892_s2 + $0x458] ss:$12 sps:$4 sm:$0xff]  }
 0x12f   :  { %1469 = vmatpush1.bf16.msra.mxu1 %v5147_v3  ;;  %4698 = vmatpush3.bf16.msra.mxu0 %v5183_v28  ;;  %v5230_v28 = vld [vmem:[%s6892_s2 + $0x470] ss:$12 sps:$4 sm:$0xff]  }
 0x130   :  { %1470 = vmatprep.subr.bf16.mxu1 %v5152_v4  ;;  %4699 = vmatprep.subr.bf16.mxu0 %v5187_v29  ;;  %v5233_v29 = vld [vmem:[%s6892_s2 + $0x484] ss:$12 sps:$4 sm:$0xff]  }
 0x133   :  { %1471 = vmatpush1.bf16.msra.mxu1 %v5150_v5  ;;  %4700 = vmatpush3.bf16.msra.mxu0 %v5188_v32  ;;  %v5199_v5 = vld [vmem:[%s6892_s2 + $0x3c0] ss:$12 sps:$4 sm:$0xff]   ;;  %v5234_v32 = vld [vmem:[%s6892_s2 + $0x498] ss:$12 sps:$4 sm:$0xff]  }
 0x134   :  { %1472 = vmatprep.subr.bf16.mxu1 %v5155_v6  ;;  %4701 = vmatprep.subr.bf16.mxu0 %v5192_v35  ;;  %v5202_v6 = vld [vmem:[%s6892_s2 + $0x3c8] ss:$12 sps:$4 sm:$0xff]   ;;  %v5242_v35 = vld [vmem:[%s6892_s2 + $0x4cc] ss:$12 sps:$4 sm:$0xff]  }
 0x137   :  { %1473 = vmatpush1.bf16.msra.mxu1 %v5153_v7  ;;  %4702 = vmatpush3.bf16.msra.mxu0 %v5193_v37  ;;  %v5245_v37 = vld [vmem:[%s6892_s2 + $0x4e4] ss:$12 sps:$4 sm:$0xff]  }
 0x138   :  { %1474 = vmatprep.subr.bf16.mxu1 %v5158_v8  ;;  %4703 = vmatprep.subr.bf16.mxu0 %v5197_v39  ;;  %v5205_v8 = vld [vmem:[%s6892_s2 + $0x3dc] ss:$12 sps:$4 sm:$0xff]  }
 0x139   :  { %v5248_v39 = vld [vmem:[%s6892_s2 + $0x4fc] ss:$12 sps:$4 sm:$0xff]  }
 0x13b   :  { %1475 = vmatpush1.bf16.msra.mxu1 %v5156_v9  ;;  %4704 = vmatpush3.bf16.msra.mxu0 %v5198_v41  ;;  %v5203_v9 = vld [vmem:[%s6892_s2 + $0x3d8] ss:$12 sps:$4 sm:$0xff]   ;;  %v5251_v41 = vld [vmem:[%s6892_s2 + $0x514] ss:$12 sps:$4 sm:$0xff]  }
 0x13c   :  { %1476 = vmatprep.subr.bf16.mxu1 %v5161_v10  ;;  %4884 = vmatprep.subr.bf16.mxu0 %v5551_v1  ;;  %v5206_v10 = vld [vmem:[%s6892_s2 + $0x3e0] ss:$12 sps:$4 sm:$0xff]  }
 0x13f   :  { %1477 = vmatpush1.bf16.msra.mxu1 %v5159_v12  ;;  %v5207_v12 = vld [vmem:[%s6892_s2 + $0x3f0] ss:$12 sps:$4 sm:$0xff]  }
 0x140   :  { %1478 = vmatprep.subr.bf16.mxu1 %v5166_v14  ;;  %v5213_v14 = vld [vmem:[%s6892_s2 + $0x40c] ss:$12 sps:$4 sm:$0xff]  }
 0x143   :  { %1479 = vmatpush1.bf16.msra.mxu1 %v5164_v18  ;;  %v5215_v18 = vld [vmem:[%s6892_s2 + $0x420] ss:$12 sps:$4 sm:$0xff]  }
 0x144   :  { %1480 = vmatprep.subr.bf16.mxu1 %v5171_v19  ;;  %v5218_v19 = vld [vmem:[%s6892_s2 + $0x428] ss:$12 sps:$4 sm:$0xff]  }
 0x147   :  { %1481 = vmatpush1.bf16.msra.mxu1 %v5169_v22  ;;  %v5222_v22 = vld [vmem:[%s6892_s2 + $0x440] ss:$12 sps:$4 sm:$0xff]  }
 0x148   :  { %1482 = vmatprep.subr.bf16.mxu1 %v5176_v23  ;;  %v5225_v23 = vld [vmem:[%s6892_s2 + $0x454] ss:$12 sps:$4 sm:$0xff]  }
 0x14b   :  { %1483 = vmatpush1.bf16.msra.mxu1 %v5174_v26  ;;  %v5229_v26 = vld [vmem:[%s6892_s2 + $0x46c] ss:$12 sps:$4 sm:$0xff]  }
 0x14c   :  { %1484 = vmatprep.subr.bf16.mxu1 %v5181_v27  ;;  %v5227_v27 = vld [vmem:[%s6892_s2 + $0x468] ss:$12 sps:$4 sm:$0xff]  }
 0x14f   :  { %1485 = vmatpush1.bf16.msra.mxu1 %v5179_v30  ;;  %v5231_v30 = vld [vmem:[%s6892_s2 + $0x480] ss:$12 sps:$4 sm:$0xff]  }
 0x150   :  { %1486 = vmatprep.subr.bf16.mxu1 %v5186_v31  ;;  %v5236_v31 = vld [vmem:[%s6892_s2 + $0x49c] ss:$12 sps:$4 sm:$0xff]  }
 0x153   :  { %1487 = vmatpush1.bf16.msra.mxu1 %v5184_v33  ;;  %v5239_v33 = vld [vmem:[%s6892_s2 + $0x4b4] ss:$12 sps:$4 sm:$0xff]  }
 0x154   :  { %1488 = vmatprep.subr.bf16.mxu1 %v5191_v34  ;;  %v5237_v34 = vld [vmem:[%s6892_s2 + $0x4b0] ss:$12 sps:$4 sm:$0xff]  }
 0x157   :  { %1489 = vmatpush1.bf16.msra.mxu1 %v5189_v36  ;;  %v5240_v36 = vld [vmem:[%s6892_s2 + $0x4c8] ss:$12 sps:$4 sm:$0xff]  }
 0x158   :  { %1490 = vmatprep.subr.bf16.mxu1 %v5196_v38  ;;  %v5243_v38 = vld [vmem:[%s6892_s2 + $0x4e0] ss:$12 sps:$4 sm:$0xff]  }
 0x15b   :  { %1491 = vmatpush1.bf16.msra.mxu1 %v5194_v40  ;;  %v5246_v40 = vld [vmem:[%s6892_s2 + $0x4f8] ss:$12 sps:$4 sm:$0xff]  }
 0x15c   :  { %1503 = vmatprep.subr.bf16.mxu1 %v5201_v42  ;;  %v5249_v42 = vld [vmem:[%s6892_s2 + $0x510] ss:$12 sps:$4 sm:$0xff]  }
 0x1d1   :  { %v4674_v43 = vpop.f32.mrb[4].mxu1 }
 0x1d2   :  { %v4675_v44 = vpop.f32.mrb[5].mxu1 }
 0x1d3   :  { %v4676_v45 = vadd.f32 %v4675_v44, %v4674_v43  ;;  %v4677_v46 = vpop.f32.mrb[6].mxu1  ;;  %v5254_v43 = vld [vmem:[%s6892_s2 + $0x52c] ss:$12 sps:$4 sm:$0xff]   ;;  %v5252_v44 = vld [vmem:[%s6892_s2 + $0x528] ss:$12 sps:$4 sm:$0xff]  }
 0x1d4   :  { %v4678_v47 = vpop.f32.mrb[7].mxu1 }
 0x1d5   :  { %v4679_v48 = vadd.f32 %v4678_v47, %v4677_v46  ;;  %v5258_v46 = vld [vmem:[%s6892_s2 + $0x548] ss:$12 sps:$4 sm:$0xff]   ;;  %v5255_v47 = vld [vmem:[%s6892_s2 + $0x540] ss:$12 sps:$4 sm:$0xff]  }
 0x1f1   :  { %v879_v49 = vpop.f32.mrb[4].mxu0  ;;  %v963_v50 = vpop.f32.mrb[8].mxu1 }
 0x1f2   :  { %v964_v51 = vadd.f32 %v4676_v45, %v963_v50  ;;  %v881_v52 = vpop.f32.mrb[5].mxu0  ;;  %v4882_v53 = vpop.f32.mrb[9].mxu1  ;;  %v970_v56 = vmax.f32 %v879_v49, 0.0  ;;  %v5257_v45 = vld [vmem:[%s6892_s2 + $0x544] ss:$12 sps:$4 sm:$0xff]  }
 0x1f3   :  { %v883_v54 = vpop.f32.mrb[6].mxu0  ;;  %v966_v55 = vpop.f32.mrb[10].mxu1  ;;  %v971_v61 = vmax.f32 %v881_v52, 0.0  ;;  %v5262_v49 = vld [vmem:[%s6892_s2 + $0x55c] ss:$12 sps:$4 sm:$0xff]  }
 0x1f4   :  { %v973_v57 = vmax.f32 %v883_v54, 0.0  ;;  %v967_v58 = vadd.f32 %v4679_v48, %v966_v55  ;;  %v885_v59 = vpop.f32.mrb[7].mxu0  ;;  %v4883_v60 = vpop.f32.mrb[11].mxu1  ;;  %v972_v63 = vmax.f32 %v964_v51, 0.0  ;;  %v5259_v48 = vld [vmem:[%s6892_s2 + $0x488] ss:$12 sps:$4 sm:$0xff]  }
 0x1f5   :  { %v974_v62 = vmax.f32 %v885_v59, 0.0  ;;  %v5263_v50 = vld [vmem:[%s6892_s2 + $0x560] ss:$12 sps:$4 sm:$0xff]   ;;  %v5268_v52 = vld [vmem:[%s6892_s2 + $0x578] ss:$12 sps:$4 sm:$0xff]  }
 0x1f6   :  { %v976_v0 = vpack.c.bf16 %v973_v57, %v970_v56  ;;  %v975_v3 = vmax.f32 %v967_v58, 0.0  ;;  %v5264_v51 = vld [vmem:[%s6892_s2 + $0x4a0] ss:$12 sps:$4 sm:$0xff]   ;;  %v5260_v53 = vld [vmem:[%s6892_s2 + $0x558] ss:$12 sps:$4 sm:$0xff]  }
 0x1f7   :  { %v977_v4 = vpack.c.bf16 %v974_v62, %v971_v61  ;;  %v5267_v54 = vld [vmem:[%s6892_s2 + $0x574] ss:$12 sps:$4 sm:$0xff]   ;;  %v5269_v55 = vld [vmem:[%s6892_s2 + $0x4b8] ss:$12 sps:$4 sm:$0xff]   ;;  %v5273_v56 = vld [vmem:[%s6892_s2 + $0x590] ss:$12 sps:$4 sm:$0xff]  }
 0x1f8   :  { %v978_v7 = vpack.c.bf16 %v975_v3, %v972_v63  ;;  %v5265_v57 = vld [vmem:[%s6892_s2 + $0x570] ss:$12 sps:$4 sm:$0xff]   ;;  %v5272_v58 = vld [vmem:[%s6892_s2 + $0x58c] ss:$12 sps:$4 sm:$0xff]   ;;  %v5278_v60 = vld [vmem:[%s6892_s2 + $0x5a8] ss:$12 sps:$4 sm:$0xff]  }
 0x1f9   :  { %1492 = vmatprep.mubr.bf16.mxu1 %v977_v4  ;;  %1578 = vmatprep.mubr.bf16.mxu0 %v977_v4  ;;  %v5274_v59 = vld [vmem:[%s6892_s2 + $0x4d0] ss:$12 sps:$4 sm:$0xff]   ;;  %v5270_v61 = vld [vmem:[%s6892_s2 + $0x588] ss:$12 sps:$4 sm:$0xff]   ;;  %v5275_v3 = vld [vmem:[%s6892_s2 + $0x5a0] ss:$12 sps:$4 sm:$0xff]  }
 0x1fa   :  { %1493 = vmatmul.mubr.bf16.vlgmr.msra.gmra.mrb[12].mxu1 %v976_v0  ;;  %1579 = vmatmul.mubr.bf16.vlgmr.msra.gmra.mrb[8].mxu0 %v976_v0  ;;  %v5277_v62 = vld [vmem:[%s6892_s2 + $0x5a4] ss:$12 sps:$4 sm:$0xff]   ;;  %v5279_v63 = vld [vmem:[%s6892_s2 + $0x4e8] ss:$12 sps:$4 sm:$0xff]   ;;  %v5283_v0 = vld [vmem:[%s6892_s2 + $0x5c0] ss:$12 sps:$4 sm:$0xff]  }
 0x1fb   :  { %1504 = vmatpush1.bf16.msra.mxu1 %v5199_v5  ;;  %4885 = vmatpush3.bf16.msra.mxu0 %v5202_v6  ;;  %v5282_v4 = vld [vmem:[%s6892_s2 + $0x5bc] ss:$12 sps:$4 sm:$0xff]   ;;  %v5284_v5 = vld [vmem:[%s6892_s2 + $0x500] ss:$12 sps:$4 sm:$0xff]   ;;  %v5280_v6 = vld [vmem:[%s6892_s2 + $0x5b8] ss:$12 sps:$4 sm:$0xff]  }
 0x1fc   :  { %1505 = vmatprep.subr.bf16.mxu1 %v5205_v8  ;;  %4886 = vmatprep.subr.bf16.mxu0 %v5551_v1  ;;  %v5288_v8 = vld [vmem:[%s6892_s2 + $0x5d8] ss:$12 sps:$4 sm:$0xff]  }
 0x1fd   :  { %1535 = vmatprep.mubr.bf16.mxu1 %v5552_v2  ;;  %4900 = vmatprep.mubr.msk.bf16.mxu0 %vm5553_vm0, %v5551_v1 }
 0x1ff   :  { %1506 = vmatpush1.bf16.msra.mxu1 %v5203_v9  ;;  %4887 = vmatpush3.bf16.msra.mxu0 %v5206_v10  ;;  %v5285_v9 = vld [vmem:[%s6892_s2 + $0x5d0] ss:$12 sps:$4 sm:$0xff]   ;;  %v5289_v10 = vld [vmem:[%s6892_s2 + $0x518] ss:$12 sps:$4 sm:$0xff]  }
 0x200   :  { %1507 = vmatprep.subr.bf16.mxu1 %v5209_v11  ;;  %4888 = vmatprep.subr.bf16.mxu0 %v5551_v1  ;;  %v5292_v11 = vld [vmem:[%s6892_s2 + $0x5ec] ss:$12 sps:$4 sm:$0xff]  }
 0x203   :  { %1508 = vmatpush1.bf16.msra.mxu1 %v5207_v12  ;;  %4889 = vmatpush3.bf16.msra.mxu0 %v5210_v13  ;;  %v5293_v12 = vld [vmem:[%s6892_s2 + $0x5f0] ss:$12 sps:$4 sm:$0xff]   ;;  %v5290_v13 = vld [vmem:[%s6892_s2 + $0x5e8] ss:$12 sps:$4 sm:$0xff]  }
 0x204   :  { %1509 = vmatprep.subr.bf16.mxu1 %v5213_v14  ;;  %4890 = vmatprep.subr.bf16.mxu0 %v5551_v1  ;;  %v5294_v14 = vld [vmem:[%s6892_s2 + $0x530] ss:$12 sps:$4 sm:$0xff]  }
 0x207   :  { %1510 = vmatpush1.bf16.msra.mxu1 %v5211_v15  ;;  %4891 = vmatpush3.bf16.msra.mxu0 %v5214_v16  ;;  %v5297_v15 = vld [vmem:[%s6892_s2 + $0x604] ss:$12 sps:$4 sm:$0xff]  }
 0x208   :  { %1511 = vmatprep.subr.bf16.mxu1 %v5217_v17  ;;  %4892 = vmatprep.subr.bf16.mxu0 %v5551_v1 }
 0x20b   :  { %1512 = vmatpush1.bf16.msra.mxu1 %v5215_v18  ;;  %4893 = vmatpush3.bf16.msra.mxu0 %v5218_v19 }
 0x20c   :  { %1513 = vmatprep.subr.bf16.mxu1 %v5221_v20  ;;  %4894 = vmatprep.subr.bf16.mxu0 %v5551_v1 }
 0x20f   :  { %1514 = vmatpush1.bf16.msra.mxu1 %v5219_v21  ;;  %4895 = vmatpush3.bf16.msra.mxu0 %v5222_v22 }
 0x210   :  { %1515 = vmatprep.subr.bf16.mxu1 %v5225_v23  ;;  %4896 = vmatprep.subr.bf16.mxu0 %v5551_v1 }
 0x213   :  { %1516 = vmatpush1.bf16.msra.mxu1 %v5223_v24  ;;  %4897 = vmatpush3.bf16.msra.mxu0 %v5226_v25 }
 0x214   :  { %1517 = vmatprep.subr.bf16.mxu1 %v5229_v26  ;;  %4898 = vmatprep.subr.bf16.mxu0 %v5551_v1 }
 0x217   :  { %1518 = vmatpush1.bf16.msra.mxu1 %v5227_v27  ;;  %4899 = vmatpush3.bf16.msra.mxu0 %v5230_v28 }
 0x218   :  { %2118 = vmatprep.subr.bf16.mxu0 %v5233_v29  ;;  %4720 = vmatprep.subr.bf16.mxu1 %v5258_v46  ;;  %v5305_v46 = vld [vmem:[%s6892_s2 + $0x634] ss:$12 sps:$4 sm:$0xff]  }
 0x21a   :  { %1536 = vmatmul.mubr.bf16.vlgmr.msra.gmra.mrb[12].mxu1 %v978_v7  ;;  %4901 = vmatmul.mubr.bf16.vlgmr.msra.gmra.mrb[12].mxu0 %v978_v7  ;;  %v5287_v7 = vld [vmem:[%s6892_s2 + $0x5d4] ss:$12 sps:$4 sm:$0xff]  }
 0x21b   :  { %2119 = vmatpush1.bf16.msra.mxu0 %v5231_v30  ;;  %4721 = vmatpush3.bf16.msra.mxu1 %v5259_v48  ;;  %v5306_v48 = vld [vmem:[%s6892_s2 + $0x638] ss:$12 sps:$4 sm:$0xff]  }
 0x21c   :  { %2120 = vmatprep.subr.bf16.mxu0 %v5236_v31  ;;  %4722 = vmatprep.subr.bf16.mxu1 %v5263_v50  ;;  %v5307_v50 = vld [vmem:[%s6892_s2 + $0x648] ss:$12 sps:$4 sm:$0xff]  }
 0x21f   :  { %2121 = vmatpush1.bf16.msra.mxu0 %v5234_v32  ;;  %4723 = vmatpush3.bf16.msra.mxu1 %v5264_v51  ;;  %v5310_v51 = vld [vmem:[%s6892_s2 + $0x650] ss:$12 sps:$4 sm:$0xff]  }
 0x220   :  { %2122 = vmatprep.subr.bf16.mxu0 %v5239_v33  ;;  %4724 = vmatprep.subr.bf16.mxu1 %v5268_v52  ;;  %v5313_v52 = vld [vmem:[%s6892_s2 + $0x664] ss:$12 sps:$4 sm:$0xff]  }
 0x223   :  { %2123 = vmatpush1.bf16.msra.mxu0 %v5237_v34  ;;  %4725 = vmatpush3.bf16.msra.mxu1 %v5269_v55  ;;  %v5317_v55 = vld [vmem:[%s6892_s2 + $0x67c] ss:$12 sps:$4 sm:$0xff]  }
 0x224   :  { %2124 = vmatprep.subr.bf16.mxu0 %v5242_v35  ;;  %4726 = vmatprep.subr.bf16.mxu1 %v5273_v56  ;;  %v5315_v56 = vld [vmem:[%s6892_s2 + $0x678] ss:$12 sps:$4 sm:$0xff]  }
 0x227   :  { %2125 = vmatpush1.bf16.msra.mxu0 %v5240_v36  ;;  %4727 = vmatpush3.bf16.msra.mxu1 %v5274_v59  ;;  %v5319_v59 = vld [vmem:[%s6892_s2 + $0x690] ss:$12 sps:$4 sm:$0xff]  }
 0x228   :  { %2126 = vmatprep.subr.bf16.mxu0 %v5245_v37  ;;  %4728 = vmatprep.subr.bf16.mxu1 %v5278_v60  ;;  %v5322_v60 = vld [vmem:[%s6892_s2 + $0x698] ss:$12 sps:$4 sm:$0xff]  }
 0x22b   :  { %2127 = vmatpush1.bf16.msra.mxu0 %v5243_v38  ;;  %4729 = vmatpush3.bf16.msra.mxu1 %v5279_v63  ;;  %v5326_v63 = vld [vmem:[%s6892_s2 + $0x6b0] ss:$12 sps:$4 sm:$0xff]  }
 0x22c   :  { %2128 = vmatprep.subr.bf16.mxu0 %v5248_v39  ;;  %4730 = vmatprep.subr.bf16.mxu1 %v5283_v0  ;;  %v5329_v0 = vld [vmem:[%s6892_s2 + $0x6c4] ss:$12 sps:$4 sm:$0xff]  }
 0x22f   :  { %2129 = vmatpush1.bf16.msra.mxu0 %v5246_v40  ;;  %4731 = vmatpush3.bf16.msra.mxu1 %v5284_v5  ;;  %v5295_v40 = vld [vmem:[%s6892_s2 + $0x600] ss:$12 sps:$4 sm:$0xff]   ;;  %v5330_v5 = vld [vmem:[%s6892_s2 + $0x6d8] ss:$12 sps:$4 sm:$0xff]  }
 0x230   :  { %2130 = vmatprep.subr.bf16.mxu0 %v5251_v41  ;;  %4732 = vmatprep.subr.bf16.mxu1 %v5288_v8  ;;  %v5298_v41 = vld [vmem:[%s6892_s2 + $0x608] ss:$12 sps:$4 sm:$0xff]   ;;  %v5338_v8 = vld [vmem:[%s6892_s2 + $0x70c] ss:$12 sps:$4 sm:$0xff]  }
 0x233   :  { %2131 = vmatpush1.bf16.msra.mxu0 %v5249_v42  ;;  %4733 = vmatpush3.bf16.msra.mxu1 %v5289_v10  ;;  %v5341_v10 = vld [vmem:[%s6892_s2 + $0x724] ss:$12 sps:$4 sm:$0xff]  }
 0x234   :  { %2132 = vmatprep.subr.bf16.mxu0 %v5254_v43  ;;  %4734 = vmatprep.subr.bf16.mxu1 %v5293_v12  ;;  %v5301_v43 = vld [vmem:[%s6892_s2 + $0x61c] ss:$12 sps:$4 sm:$0xff]  }
 0x235   :  { %v5344_v12 = vld [vmem:[%s6892_s2 + $0x73c] ss:$12 sps:$4 sm:$0xff]  }
 0x237   :  { %2133 = vmatpush1.bf16.msra.mxu0 %v5252_v44  ;;  %4735 = vmatpush3.bf16.msra.mxu1 %v5294_v14  ;;  %v5299_v44 = vld [vmem:[%s6892_s2 + $0x618] ss:$12 sps:$4 sm:$0xff]   ;;  %v5347_v14 = vld [vmem:[%s6892_s2 + $0x754] ss:$12 sps:$4 sm:$0xff]  }
 0x238   :  { %2134 = vmatprep.subr.bf16.mxu0 %v5257_v45  ;;  %4904 = vmatprep.subr.bf16.mxu1 %v5551_v1  ;;  %v5302_v45 = vld [vmem:[%s6892_s2 + $0x620] ss:$12 sps:$4 sm:$0xff]  }
 0x23b   :  { %2135 = vmatpush1.bf16.msra.mxu0 %v5255_v47  ;;  %v5303_v47 = vld [vmem:[%s6892_s2 + $0x630] ss:$12 sps:$4 sm:$0xff]  }
 0x23c   :  { %2136 = vmatprep.subr.bf16.mxu0 %v5262_v49  ;;  %v5309_v49 = vld [vmem:[%s6892_s2 + $0x64c] ss:$12 sps:$4 sm:$0xff]  }
 0x23f   :  { %2137 = vmatpush1.bf16.msra.mxu0 %v5260_v53  ;;  %v5311_v53 = vld [vmem:[%s6892_s2 + $0x660] ss:$12 sps:$4 sm:$0xff]  }
 0x240   :  { %2138 = vmatprep.subr.bf16.mxu0 %v5267_v54  ;;  %v5314_v54 = vld [vmem:[%s6892_s2 + $0x668] ss:$12 sps:$4 sm:$0xff]  }
 0x243   :  { %2139 = vmatpush1.bf16.msra.mxu0 %v5265_v57  ;;  %v5318_v57 = vld [vmem:[%s6892_s2 + $0x680] ss:$12 sps:$4 sm:$0xff]  }
 0x244   :  { %2140 = vmatprep.subr.bf16.mxu0 %v5272_v58  ;;  %v5321_v58 = vld [vmem:[%s6892_s2 + $0x694] ss:$12 sps:$4 sm:$0xff]  }
 0x247   :  { %2141 = vmatpush1.bf16.msra.mxu0 %v5270_v61  ;;  %v5325_v61 = vld [vmem:[%s6892_s2 + $0x6ac] ss:$12 sps:$4 sm:$0xff]  }
 0x248   :  { %2142 = vmatprep.subr.bf16.mxu0 %v5277_v62  ;;  %v5323_v62 = vld [vmem:[%s6892_s2 + $0x6a8] ss:$12 sps:$4 sm:$0xff]  }
 0x24b   :  { %2143 = vmatpush1.bf16.msra.mxu0 %v5275_v3  ;;  %v5327_v3 = vld [vmem:[%s6892_s2 + $0x6c0] ss:$12 sps:$4 sm:$0xff]  }
 0x24c   :  { %2144 = vmatprep.subr.bf16.mxu0 %v5282_v4  ;;  %v5332_v4 = vld [vmem:[%s6892_s2 + $0x6dc] ss:$12 sps:$4 sm:$0xff]  }
 0x24f   :  { %2145 = vmatpush1.bf16.msra.mxu0 %v5280_v6  ;;  %v5335_v6 = vld [vmem:[%s6892_s2 + $0x6f4] ss:$12 sps:$4 sm:$0xff]  }
 0x250   :  { %2146 = vmatprep.subr.bf16.mxu0 %v5287_v7  ;;  %v5333_v7 = vld [vmem:[%s6892_s2 + $0x6f0] ss:$12 sps:$4 sm:$0xff]  }
 0x253   :  { %2147 = vmatpush1.bf16.msra.mxu0 %v5285_v9  ;;  %v5336_v9 = vld [vmem:[%s6892_s2 + $0x708] ss:$12 sps:$4 sm:$0xff]  }
 0x254   :  { %2148 = vmatprep.subr.bf16.mxu0 %v5292_v11  ;;  %v5339_v11 = vld [vmem:[%s6892_s2 + $0x720] ss:$12 sps:$4 sm:$0xff]  }
 0x257   :  { %2149 = vmatpush1.bf16.msra.mxu0 %v5290_v13  ;;  %v5342_v13 = vld [vmem:[%s6892_s2 + $0x738] ss:$12 sps:$4 sm:$0xff]  }
 0x258   :  { %2161 = vmatprep.subr.bf16.mxu0 %v5297_v15  ;;  %v5345_v15 = vld [vmem:[%s6892_s2 + $0x750] ss:$12 sps:$4 sm:$0xff]  }
 0x2cd   :  { %v4705_v16 = vpop.f32.mrb[8].mxu0 }
 0x2ce   :  { %v4706_v17 = vpop.f32.mrb[9].mxu0 }
 0x2cf   :  { %v4707_v18 = vadd.f32 %v4706_v17, %v4705_v16  ;;  %v4708_v19 = vpop.f32.mrb[10].mxu0  ;;  %v5350_v16 = vld [vmem:[%s6892_s2 + $0x76c] ss:$12 sps:$4 sm:$0xff]   ;;  %v5348_v17 = vld [vmem:[%s6892_s2 + $0x768] ss:$12 sps:$4 sm:$0xff]  }
 0x2d0   :  { %v4709_v20 = vpop.f32.mrb[11].mxu0 }
 0x2d1   :  { %v4710_v21 = vadd.f32 %v4709_v20, %v4708_v19  ;;  %v5354_v19 = vld [vmem:[%s6892_s2 + $0x788] ss:$12 sps:$4 sm:$0xff]   ;;  %v5351_v20 = vld [vmem:[%s6892_s2 + $0x780] ss:$12 sps:$4 sm:$0xff]  }
 0x2ed   :  { %v1537_v22 = vpop.f32.mrb[12].mxu1  ;;  %v1621_v23 = vpop.f32.mrb[12].mxu0 }
 0x2ee   :  { %v1622_v24 = vadd.f32 %v4707_v18, %v1621_v23  ;;  %v1539_v25 = vpop.f32.mrb[13].mxu1  ;;  %v4902_v26 = vpop.f32.mrb[13].mxu0  ;;  %v1628_v29 = vmax.f32 %v1537_v22, 0.0  ;;  %v5353_v18 = vld [vmem:[%s6892_s2 + $0x784] ss:$12 sps:$4 sm:$0xff]  }
 0x2ef   :  { %v1541_v27 = vpop.f32.mrb[14].mxu1  ;;  %v1624_v28 = vpop.f32.mrb[14].mxu0  ;;  %v1629_v34 = vmax.f32 %v1539_v25, 0.0  ;;  %v5358_v22 = vld [vmem:[%s6892_s2 + $0x79c] ss:$12 sps:$4 sm:$0xff]  }
 0x2f0   :  { %v1631_v30 = vmax.f32 %v1541_v27, 0.0  ;;  %v1625_v31 = vadd.f32 %v4710_v21, %v1624_v28  ;;  %v1543_v32 = vpop.f32.mrb[15].mxu1  ;;  %v4903_v33 = vpop.f32.mrb[15].mxu0  ;;  %v1630_v36 = vmax.f32 %v1622_v24, 0.0  ;;  %v5355_v21 = vld [vmem:[%s6892_s2 + $0x6c8] ss:$12 sps:$4 sm:$0xff]  }
 0x2f1   :  { %v1632_v35 = vmax.f32 %v1543_v32, 0.0  ;;  %v5359_v23 = vld [vmem:[%s6892_s2 + $0x7a0] ss:$12 sps:$4 sm:$0xff]   ;;  %v5364_v25 = vld [vmem:[%s6892_s2 + $0x7b8] ss:$12 sps:$4 sm:$0xff]  }
 0x2f2   :  { %v1634_v37 = vpack.c.bf16 %v1631_v30, %v1628_v29  ;;  %v1633_v38 = vmax.f32 %v1625_v31, 0.0  ;;  %v5360_v24 = vld [vmem:[%s6892_s2 + $0x6e0] ss:$12 sps:$4 sm:$0xff]   ;;  %v5356_v26 = vld [vmem:[%s6892_s2 + $0x798] ss:$12 sps:$4 sm:$0xff]  }
 0x2f3   :  { %v1635_v39 = vpack.c.bf16 %v1632_v35, %v1629_v34  ;;  %v5363_v27 = vld [vmem:[%s6892_s2 + $0x7b4] ss:$12 sps:$4 sm:$0xff]   ;;  %v5365_v28 = vld [vmem:[%s6892_s2 + $0x6f8] ss:$12 sps:$4 sm:$0xff]   ;;  %v5369_v29 = vld [vmem:[%s6892_s2 + $0x7d0] ss:$12 sps:$4 sm:$0xff]  }
 0x2f4   :  { %v1636_v42 = vpack.c.bf16 %v1633_v38, %v1630_v36  ;;  %v5361_v30 = vld [vmem:[%s6892_s2 + $0x7b0] ss:$12 sps:$4 sm:$0xff]   ;;  %v5368_v31 = vld [vmem:[%s6892_s2 + $0x7cc] ss:$12 sps:$4 sm:$0xff]   ;;  %v5374_v33 = vld [vmem:[%s6892_s2 + $0x7e8] ss:$12 sps:$4 sm:$0xff]  }
 0x2f5   :  { %2150 = vmatprep.mubr.bf16.mxu0 %v1635_v39  ;;  %2236 = vmatprep.mubr.bf16.mxu1 %v1635_v39  ;;  %v5370_v32 = vld [vmem:[%s6892_s2 + $0x710] ss:$12 sps:$4 sm:$0xff]   ;;  %v5366_v34 = vld [vmem:[%s6892_s2 + $0x7c8] ss:$12 sps:$4 sm:$0xff]   ;;  %v5371_v38 = vld [vmem:[%s6892_s2 + $0x7e0] ss:$12 sps:$4 sm:$0xff]  }
 0x2f6   :  { %2151 = vmatmul.mubr.bf16.vlgmr.msra.gmra.mrb[16].mxu0 %v1634_v37  ;;  %2237 = vmatmul.mubr.bf16.vlgmr.msra.gmra.mrb[16].mxu1 %v1634_v37  ;;  %v5373_v35 = vld [vmem:[%s6892_s2 + $0x7e4] ss:$12 sps:$4 sm:$0xff]   ;;  %v5375_v36 = vld [vmem:[%s6892_s2 + $0x728] ss:$12 sps:$4 sm:$0xff]   ;;  %v5379_v37 = vld [vmem:[%s6892_s2 + $0x800] ss:$12 sps:$4 sm:$0xff]  }
 0x2f7   :  { %2162 = vmatpush1.bf16.msra.mxu0 %v5295_v40  ;;  %4905 = vmatpush3.bf16.msra.mxu1 %v5298_v41  ;;  %v5378_v39 = vld [vmem:[%s6892_s2 + $0x7fc] ss:$12 sps:$4 sm:$0xff]   ;;  %v5380_v40 = vld [vmem:[%s6892_s2 + $0x740] ss:$12 sps:$4 sm:$0xff]   ;;  %v5376_v41 = vld [vmem:[%s6892_s2 + $0x7f8] ss:$12 sps:$4 sm:$0xff]  }
 0x2f8   :  { %2163 = vmatprep.subr.bf16.mxu0 %v5301_v43  ;;  %4906 = vmatprep.subr.bf16.mxu1 %v5551_v1  ;;  %v5384_v43 = vld [vmem:[%s6892_s2 + $0x818] ss:$12 sps:$4 sm:$0xff]  }
 0x2f9   :  { %2193 = vmatprep.mubr.bf16.mxu0 %v5552_v2  ;;  %4920 = vmatprep.mubr.msk.bf16.mxu1 %vm5553_vm0, %v5551_v1 }
 0x2fb   :  { %2164 = vmatpush1.bf16.msra.mxu0 %v5299_v44  ;;  %4907 = vmatpush3.bf16.msra.mxu1 %v5302_v45  ;;  %v5381_v44 = vld [vmem:[%s6892_s2 + $0x810] ss:$12 sps:$4 sm:$0xff]   ;;  %v5385_v45 = vld [vmem:[%s6892_s2 + $0x758] ss:$12 sps:$4 sm:$0xff]  }
 0x2fc   :  { %2165 = vmatprep.subr.bf16.mxu0 %v5305_v46  ;;  %4908 = vmatprep.subr.bf16.mxu1 %v5551_v1  ;;  %v5388_v46 = vld [vmem:[%s6892_s2 + $0x82c] ss:$12 sps:$4 sm:$0xff]  }
 0x2ff   :  { %2166 = vmatpush1.bf16.msra.mxu0 %v5303_v47  ;;  %4909 = vmatpush3.bf16.msra.mxu1 %v5306_v48  ;;  %v5389_v47 = vld [vmem:[%s6892_s2 + $0x830] ss:$12 sps:$4 sm:$0xff]   ;;  %v5386_v48 = vld [vmem:[%s6892_s2 + $0x828] ss:$12 sps:$4 sm:$0xff]  }
 0x300   :  { %2167 = vmatprep.subr.bf16.mxu0 %v5309_v49  ;;  %4910 = vmatprep.subr.bf16.mxu1 %v5551_v1  ;;  %v5390_v49 = vld [vmem:[%s6892_s2 + $0x770] ss:$12 sps:$4 sm:$0xff]  }
 0x303   :  { %2168 = vmatpush1.bf16.msra.mxu0 %v5307_v50  ;;  %4911 = vmatpush3.bf16.msra.mxu1 %v5310_v51  ;;  %v5393_v50 = vld [vmem:[%s6892_s2 + $0x844] ss:$12 sps:$4 sm:$0xff]  }
 0x304   :  { %2169 = vmatprep.subr.bf16.mxu0 %v5313_v52  ;;  %4912 = vmatprep.subr.bf16.mxu1 %v5551_v1 }
 0x307   :  { %2170 = vmatpush1.bf16.msra.mxu0 %v5311_v53  ;;  %4913 = vmatpush3.bf16.msra.mxu1 %v5314_v54 }
 0x308   :  { %2171 = vmatprep.subr.bf16.mxu0 %v5317_v55  ;;  %4914 = vmatprep.subr.bf16.mxu1 %v5551_v1 }
 0x30b   :  { %2172 = vmatpush1.bf16.msra.mxu0 %v5315_v56  ;;  %4915 = vmatpush3.bf16.msra.mxu1 %v5318_v57 }
 0x30c   :  { %2173 = vmatprep.subr.bf16.mxu0 %v5321_v58  ;;  %4916 = vmatprep.subr.bf16.mxu1 %v5551_v1 }
 0x30f   :  { %2174 = vmatpush1.bf16.msra.mxu0 %v5319_v59  ;;  %4917 = vmatpush3.bf16.msra.mxu1 %v5322_v60 }
 0x310   :  { %2175 = vmatprep.subr.bf16.mxu0 %v5325_v61  ;;  %4918 = vmatprep.subr.bf16.mxu1 %v5551_v1 }
 0x313   :  { %2176 = vmatpush1.bf16.msra.mxu0 %v5323_v62  ;;  %4919 = vmatpush3.bf16.msra.mxu1 %v5326_v63 }
 0x314   :  { %2776 = vmatprep.subr.bf16.mxu1 %v5329_v0  ;;  %4751 = vmatprep.subr.bf16.mxu0 %v5354_v19  ;;  %v5401_v19 = vld [vmem:[%s6892_s2 + $0x874] ss:$12 sps:$4 sm:$0xff]  }
 0x316   :  { %2194 = vmatmul.mubr.bf16.vlgmr.msra.gmra.mrb[16].mxu0 %v1636_v42  ;;  %4921 = vmatmul.mubr.bf16.vlgmr.msra.gmra.mrb[20].mxu1 %v1636_v42  ;;  %v5383_v42 = vld [vmem:[%s6892_s2 + $0x814] ss:$12 sps:$4 sm:$0xff]  }
 0x317   :  { %2777 = vmatpush1.bf16.msra.mxu1 %v5327_v3  ;;  %4752 = vmatpush3.bf16.msra.mxu0 %v5355_v21  ;;  %v5402_v21 = vld [vmem:[%s6892_s2 + $0x878] ss:$12 sps:$4 sm:$0xff]  }
 0x318   :  { %2778 = vmatprep.subr.bf16.mxu1 %v5332_v4  ;;  %4753 = vmatprep.subr.bf16.mxu0 %v5359_v23  ;;  %v5403_v23 = vld [vmem:[%s6892_s2 + $0x888] ss:$12 sps:$4 sm:$0xff]  }
 0x31b   :  { %2779 = vmatpush1.bf16.msra.mxu1 %v5330_v5  ;;  %4754 = vmatpush3.bf16.msra.mxu0 %v5360_v24  ;;  %v5406_v24 = vld [vmem:[%s6892_s2 + $0x890] ss:$12 sps:$4 sm:$0xff]  }
 0x31c   :  { %2780 = vmatprep.subr.bf16.mxu1 %v5335_v6  ;;  %4755 = vmatprep.subr.bf16.mxu0 %v5364_v25  ;;  %v5409_v25 = vld [vmem:[%s6892_s2 + $0x8a4] ss:$12 sps:$4 sm:$0xff]  }
 0x31f   :  { %2781 = vmatpush1.bf16.msra.mxu1 %v5333_v7  ;;  %4756 = vmatpush3.bf16.msra.mxu0 %v5365_v28  ;;  %v5413_v28 = vld [vmem:[%s6892_s2 + $0x8bc] ss:$12 sps:$4 sm:$0xff]  }
 0x320   :  { %2782 = vmatprep.subr.bf16.mxu1 %v5338_v8  ;;  %4757 = vmatprep.subr.bf16.mxu0 %v5369_v29  ;;  %v5411_v29 = vld [vmem:[%s6892_s2 + $0x8b8] ss:$12 sps:$4 sm:$0xff]  }
 0x323   :  { %2783 = vmatpush1.bf16.msra.mxu1 %v5336_v9  ;;  %4758 = vmatpush3.bf16.msra.mxu0 %v5370_v32  ;;  %v5415_v32 = vld [vmem:[%s6892_s2 + $0x8d0] ss:$12 sps:$4 sm:$0xff]  }
 0x324   :  { %2784 = vmatprep.subr.bf16.mxu1 %v5341_v10  ;;  %4759 = vmatprep.subr.bf16.mxu0 %v5374_v33  ;;  %v5418_v33 = vld [vmem:[%s6892_s2 + $0x8d8] ss:$12 sps:$4 sm:$0xff]  }
 0x327   :  { %2785 = vmatpush1.bf16.msra.mxu1 %v5339_v11  ;;  %4760 = vmatpush3.bf16.msra.mxu0 %v5375_v36  ;;  %v5422_v36 = vld [vmem:[%s6892_s2 + $0x8f0] ss:$12 sps:$4 sm:$0xff]  }
 0x328   :  { %2786 = vmatprep.subr.bf16.mxu1 %v5344_v12  ;;  %4761 = vmatprep.subr.bf16.mxu0 %v5379_v37  ;;  %v5425_v37 = vld [vmem:[%s6892_s2 + $0x904] ss:$12 sps:$4 sm:$0xff]  }
 0x32b   :  { %2787 = vmatpush1.bf16.msra.mxu1 %v5342_v13  ;;  %4762 = vmatpush3.bf16.msra.mxu0 %v5380_v40  ;;  %v5391_v13 = vld [vmem:[%s6892_s2 + $0x840] ss:$12 sps:$4 sm:$0xff]   ;;  %v5426_v40 = vld [vmem:[%s6892_s2 + $0x918] ss:$12 sps:$4 sm:$0xff]  }
 0x32c   :  { %2788 = vmatprep.subr.bf16.mxu1 %v5347_v14  ;;  %4763 = vmatprep.subr.bf16.mxu0 %v5384_v43  ;;  %v5394_v14 = vld [vmem:[%s6892_s2 + $0x848] ss:$12 sps:$4 sm:$0xff]   ;;  %v5434_v43 = vld [vmem:[%s6892_s2 + $0x94c] ss:$12 sps:$4 sm:$0xff]  }
 0x32f   :  { %2789 = vmatpush1.bf16.msra.mxu1 %v5345_v15  ;;  %4764 = vmatpush3.bf16.msra.mxu0 %v5385_v45  ;;  %v5437_v45 = vld [vmem:[%s6892_s2 + $0x964] ss:$12 sps:$4 sm:$0xff]  }
 0x330   :  { %2790 = vmatprep.subr.bf16.mxu1 %v5350_v16  ;;  %4765 = vmatprep.subr.bf16.mxu0 %v5389_v47  ;;  %v5397_v16 = vld [vmem:[%s6892_s2 + $0x85c] ss:$12 sps:$4 sm:$0xff]  }
 0x331   :  { %v5440_v47 = vld [vmem:[%s6892_s2 + $0x97c] ss:$12 sps:$4 sm:$0xff]  }
 0x333   :  { %2791 = vmatpush1.bf16.msra.mxu1 %v5348_v17  ;;  %4766 = vmatpush3.bf16.msra.mxu0 %v5390_v49  ;;  %v5395_v17 = vld [vmem:[%s6892_s2 + $0x858] ss:$12 sps:$4 sm:$0xff]   ;;  %v5443_v49 = vld [vmem:[%s6892_s2 + $0x994] ss:$12 sps:$4 sm:$0xff]  }
 0x334   :  { %2792 = vmatprep.subr.bf16.mxu1 %v5353_v18  ;;  %4924 = vmatprep.subr.bf16.mxu0 %v5551_v1  ;;  %v5398_v18 = vld [vmem:[%s6892_s2 + $0x860] ss:$12 sps:$4 sm:$0xff]  }
 0x337   :  { %2793 = vmatpush1.bf16.msra.mxu1 %v5351_v20  ;;  %v5399_v20 = vld [vmem:[%s6892_s2 + $0x870] ss:$12 sps:$4 sm:$0xff]  }
 0x338   :  { %2794 = vmatprep.subr.bf16.mxu1 %v5358_v22  ;;  %v5405_v22 = vld [vmem:[%s6892_s2 + $0x88c] ss:$12 sps:$4 sm:$0xff]  }
 0x33b   :  { %2795 = vmatpush1.bf16.msra.mxu1 %v5356_v26  ;;  %v5407_v26 = vld [vmem:[%s6892_s2 + $0x8a0] ss:$12 sps:$4 sm:$0xff]  }
 0x33c   :  { %2796 = vmatprep.subr.bf16.mxu1 %v5363_v27  ;;  %v5410_v27 = vld [vmem:[%s6892_s2 + $0x8a8] ss:$12 sps:$4 sm:$0xff]  }
 0x33f   :  { %2797 = vmatpush1.bf16.msra.mxu1 %v5361_v30  ;;  %v5414_v30 = vld [vmem:[%s6892_s2 + $0x8c0] ss:$12 sps:$4 sm:$0xff]  }
 0x340   :  { %2798 = vmatprep.subr.bf16.mxu1 %v5368_v31  ;;  %v5417_v31 = vld [vmem:[%s6892_s2 + $0x8d4] ss:$12 sps:$4 sm:$0xff]  }
 0x343   :  { %2799 = vmatpush1.bf16.msra.mxu1 %v5366_v34  ;;  %v5421_v34 = vld [vmem:[%s6892_s2 + $0x8ec] ss:$12 sps:$4 sm:$0xff]  }
 0x344   :  { %2800 = vmatprep.subr.bf16.mxu1 %v5373_v35  ;;  %v5419_v35 = vld [vmem:[%s6892_s2 + $0x8e8] ss:$12 sps:$4 sm:$0xff]  }
 0x347   :  { %2801 = vmatpush1.bf16.msra.mxu1 %v5371_v38  ;;  %v5423_v38 = vld [vmem:[%s6892_s2 + $0x900] ss:$12 sps:$4 sm:$0xff]  }
 0x348   :  { %2802 = vmatprep.subr.bf16.mxu1 %v5378_v39  ;;  %v5428_v39 = vld [vmem:[%s6892_s2 + $0x91c] ss:$12 sps:$4 sm:$0xff]  }
 0x34b   :  { %2803 = vmatpush1.bf16.msra.mxu1 %v5376_v41  ;;  %v5431_v41 = vld [vmem:[%s6892_s2 + $0x934] ss:$12 sps:$4 sm:$0xff]  }
 0x34c   :  { %2804 = vmatprep.subr.bf16.mxu1 %v5383_v42  ;;  %v5429_v42 = vld [vmem:[%s6892_s2 + $0x930] ss:$12 sps:$4 sm:$0xff]  }
 0x34f   :  { %2805 = vmatpush1.bf16.msra.mxu1 %v5381_v44  ;;  %v5432_v44 = vld [vmem:[%s6892_s2 + $0x948] ss:$12 sps:$4 sm:$0xff]  }
 0x350   :  { %2806 = vmatprep.subr.bf16.mxu1 %v5388_v46  ;;  %v5435_v46 = vld [vmem:[%s6892_s2 + $0x960] ss:$12 sps:$4 sm:$0xff]  }
 0x353   :  { %2807 = vmatpush1.bf16.msra.mxu1 %v5386_v48  ;;  %v5438_v48 = vld [vmem:[%s6892_s2 + $0x978] ss:$12 sps:$4 sm:$0xff]  }
 0x354   :  { %2819 = vmatprep.subr.bf16.mxu1 %v5393_v50  ;;  %v5441_v50 = vld [vmem:[%s6892_s2 + $0x990] ss:$12 sps:$4 sm:$0xff]  }
 0x3c9   :  { %v4736_v51 = vpop.f32.mrb[16].mxu1 }
 0x3ca   :  { %v4737_v52 = vpop.f32.mrb[17].mxu1 }
 0x3cb   :  { %v4738_v53 = vadd.f32 %v4737_v52, %v4736_v51  ;;  %v4739_v54 = vpop.f32.mrb[18].mxu1  ;;  %v5446_v51 = vld [vmem:[%s6892_s2 + $0x9ac] ss:$12 sps:$4 sm:$0xff]   ;;  %v5444_v52 = vld [vmem:[%s6892_s2 + $0x9a8] ss:$12 sps:$4 sm:$0xff]  }
 0x3cc   :  { %v4740_v55 = vpop.f32.mrb[19].mxu1 }
 0x3cd   :  { %v4741_v56 = vadd.f32 %v4740_v55, %v4739_v54  ;;  %v5450_v54 = vld [vmem:[%s6892_s2 + $0x9c8] ss:$12 sps:$4 sm:$0xff]   ;;  %v5447_v55 = vld [vmem:[%s6892_s2 + $0x9c0] ss:$12 sps:$4 sm:$0xff]  }
 0x3e9   :  { %v2195_v57 = vpop.f32.mrb[16].mxu0  ;;  %v2279_v58 = vpop.f32.mrb[20].mxu1 }
 0x3ea   :  { %v2280_v59 = vadd.f32 %v4738_v53, %v2279_v58  ;;  %v2197_v60 = vpop.f32.mrb[17].mxu0  ;;  %v4922_v61 = vpop.f32.mrb[21].mxu1  ;;  %v2286_v0 = vmax.f32 %v2195_v57, 0.0  ;;  %v5449_v53 = vld [vmem:[%s6892_s2 + $0x9c4] ss:$12 sps:$4 sm:$0xff]  }
 0x3eb   :  { %v2199_v62 = vpop.f32.mrb[18].mxu0  ;;  %v2282_v63 = vpop.f32.mrb[22].mxu1  ;;  %v2287_v7 = vmax.f32 %v2197_v60, 0.0  ;;  %v5454_v57 = vld [vmem:[%s6892_s2 + $0x9dc] ss:$12 sps:$4 sm:$0xff]  }
 0x3ec   :  { %v2289_v3 = vmax.f32 %v2199_v62, 0.0  ;;  %v2283_v4 = vadd.f32 %v4741_v56, %v2282_v63  ;;  %v2201_v5 = vpop.f32.mrb[19].mxu0  ;;  %v4923_v6 = vpop.f32.mrb[23].mxu1  ;;  %v2288_v9 = vmax.f32 %v2280_v59, 0.0  ;;  %v5451_v56 = vld [vmem:[%s6892_s2 + $0x908] ss:$12 sps:$4 sm:$0xff]  }
 0x3ed   :  { %v2290_v8 = vmax.f32 %v2201_v5, 0.0  ;;  %v5455_v58 = vld [vmem:[%s6892_s2 + $0x9e0] ss:$12 sps:$4 sm:$0xff]   ;;  %v5460_v60 = vld [vmem:[%s6892_s2 + $0x9f8] ss:$12 sps:$4 sm:$0xff]  }
 0x3ee   :  { %v2292_v10 = vpack.c.bf16 %v2289_v3, %v2286_v0  ;;  %v2291_v11 = vmax.f32 %v2283_v4, 0.0  ;;  %v5456_v59 = vld [vmem:[%s6892_s2 + $0x920] ss:$12 sps:$4 sm:$0xff]   ;;  %v5452_v61 = vld [vmem:[%s6892_s2 + $0x9d8] ss:$12 sps:$4 sm:$0xff]  }
 0x3ef   :  { %v2293_v12 = vpack.c.bf16 %v2290_v8, %v2287_v7  ;;  %v5459_v62 = vld [vmem:[%s6892_s2 + $0x9f4] ss:$12 sps:$4 sm:$0xff]   ;;  %v5461_v63 = vld [vmem:[%s6892_s2 + $0x938] ss:$12 sps:$4 sm:$0xff]   ;;  %v5465_v0 = vld [vmem:[%s6892_s2 + $0xa10] ss:$12 sps:$4 sm:$0xff]  }
 0x3f0   :  { %v2294_v15 = vpack.c.bf16 %v2291_v11, %v2288_v9  ;;  %v5457_v3 = vld [vmem:[%s6892_s2 + $0x9f0] ss:$12 sps:$4 sm:$0xff]   ;;  %v5464_v4 = vld [vmem:[%s6892_s2 + $0xa0c] ss:$12 sps:$4 sm:$0xff]   ;;  %v5470_v6 = vld [vmem:[%s6892_s2 + $0xa28] ss:$12 sps:$4 sm:$0xff]  }
 0x3f1   :  { %2808 = vmatprep.mubr.bf16.mxu1 %v2293_v12  ;;  %2894 = vmatprep.mubr.bf16.mxu0 %v2293_v12  ;;  %v5466_v5 = vld [vmem:[%s6892_s2 + $0x950] ss:$12 sps:$4 sm:$0xff]   ;;  %v5462_v7 = vld [vmem:[%s6892_s2 + $0xa08] ss:$12 sps:$4 sm:$0xff]   ;;  %v5467_v11 = vld [vmem:[%s6892_s2 + $0xa20] ss:$12 sps:$4 sm:$0xff]  }
 0x3f2   :  { %2809 = vmatmul.mubr.bf16.vlgmr.msra.gmra.mrb[24].mxu1 %v2292_v10  ;;  %2895 = vmatmul.mubr.bf16.vlgmr.msra.gmra.mrb[20].mxu0 %v2292_v10  ;;  %v5469_v8 = vld [vmem:[%s6892_s2 + $0xa24] ss:$12 sps:$4 sm:$0xff]   ;;  %v5471_v9 = vld [vmem:[%s6892_s2 + $0x968] ss:$12 sps:$4 sm:$0xff]   ;;  %v5475_v10 = vld [vmem:[%s6892_s2 + $0xa40] ss:$12 sps:$4 sm:$0xff]  }
 0x3f3   :  { %2820 = vmatpush1.bf16.msra.mxu1 %v5391_v13  ;;  %4925 = vmatpush3.bf16.msra.mxu0 %v5394_v14  ;;  %v5474_v12 = vld [vmem:[%s6892_s2 + $0xa3c] ss:$12 sps:$4 sm:$0xff]   ;;  %v5476_v13 = vld [vmem:[%s6892_s2 + $0x980] ss:$12 sps:$4 sm:$0xff]   ;;  %v5472_v14 = vld [vmem:[%s6892_s2 + $0xa38] ss:$12 sps:$4 sm:$0xff]  }
 0x3f4   :  { %2821 = vmatprep.subr.bf16.mxu1 %v5397_v16  ;;  %4926 = vmatprep.subr.bf16.mxu0 %v5551_v1  ;;  %v5480_v16 = vld [vmem:[%s6892_s2 + $0xa58] ss:$12 sps:$4 sm:$0xff]  }
 0x3f5   :  { %2851 = vmatprep.mubr.bf16.mxu1 %v5552_v2  ;;  %4940 = vmatprep.mubr.msk.bf16.mxu0 %vm5553_vm0, %v5551_v1 }
 0x3f7   :  { %2822 = vmatpush1.bf16.msra.mxu1 %v5395_v17  ;;  %4927 = vmatpush3.bf16.msra.mxu0 %v5398_v18  ;;  %v5477_v17 = vld [vmem:[%s6892_s2 + $0xa50] ss:$12 sps:$4 sm:$0xff]   ;;  %v5481_v18 = vld [vmem:[%s6892_s2 + $0x998] ss:$12 sps:$4 sm:$0xff]  }
 0x3f8   :  { %2823 = vmatprep.subr.bf16.mxu1 %v5401_v19  ;;  %4928 = vmatprep.subr.bf16.mxu0 %v5551_v1  ;;  %v5484_v19 = vld [vmem:[%s6892_s2 + $0xa6c] ss:$12 sps:$4 sm:$0xff]  }
 0x3fb   :  { %2824 = vmatpush1.bf16.msra.mxu1 %v5399_v20  ;;  %4929 = vmatpush3.bf16.msra.mxu0 %v5402_v21  ;;  %v5485_v20 = vld [vmem:[%s6892_s2 + $0xa70] ss:$12 sps:$4 sm:$0xff]   ;;  %v5482_v21 = vld [vmem:[%s6892_s2 + $0xa68] ss:$12 sps:$4 sm:$0xff]  }
 0x3fc   :  { %2825 = vmatprep.subr.bf16.mxu1 %v5405_v22  ;;  %4930 = vmatprep.subr.bf16.mxu0 %v5551_v1  ;;  %v5486_v22 = vld [vmem:[%s6892_s2 + $0x9b0] ss:$12 sps:$4 sm:$0xff]  }
 0x3ff   :  { %2826 = vmatpush1.bf16.msra.mxu1 %v5403_v23  ;;  %4931 = vmatpush3.bf16.msra.mxu0 %v5406_v24  ;;  %v5489_v23 = vld [vmem:[%s6892_s2 + $0xa84] ss:$12 sps:$4 sm:$0xff]  }
 0x400   :  { %2827 = vmatprep.subr.bf16.mxu1 %v5409_v25  ;;  %4932 = vmatprep.subr.bf16.mxu0 %v5551_v1 }
 0x403   :  { %2828 = vmatpush1.bf16.msra.mxu1 %v5407_v26  ;;  %4933 = vmatpush3.bf16.msra.mxu0 %v5410_v27 }
 0x404   :  { %2829 = vmatprep.subr.bf16.mxu1 %v5413_v28  ;;  %4934 = vmatprep.subr.bf16.mxu0 %v5551_v1 }
 0x407   :  { %2830 = vmatpush1.bf16.msra.mxu1 %v5411_v29  ;;  %4935 = vmatpush3.bf16.msra.mxu0 %v5414_v30 }
 0x408   :  { %2831 = vmatprep.subr.bf16.mxu1 %v5417_v31  ;;  %4936 = vmatprep.subr.bf16.mxu0 %v5551_v1 }
 0x40b   :  { %2832 = vmatpush1.bf16.msra.mxu1 %v5415_v32  ;;  %4937 = vmatpush3.bf16.msra.mxu0 %v5418_v33 }
 0x40c   :  { %2833 = vmatprep.subr.bf16.mxu1 %v5421_v34  ;;  %4938 = vmatprep.subr.bf16.mxu0 %v5551_v1 }
 0x40f   :  { %2834 = vmatpush1.bf16.msra.mxu1 %v5419_v35  ;;  %4939 = vmatpush3.bf16.msra.mxu0 %v5422_v36 }
 0x410   :  { %3434 = vmatprep.subr.bf16.mxu0 %v5425_v37  ;;  %4782 = vmatprep.subr.bf16.mxu1 %v5450_v54  ;;  %v5497_v54 = vld [vmem:[%s6892_s2 + $0xab4] ss:$12 sps:$4 sm:$0xff]  }
 0x412   :  { %2852 = vmatmul.mubr.bf16.vlgmr.msra.gmra.mrb[24].mxu1 %v2294_v15  ;;  %4941 = vmatmul.mubr.bf16.vlgmr.msra.gmra.mrb[24].mxu0 %v2294_v15  ;;  %v5479_v15 = vld [vmem:[%s6892_s2 + $0xa54] ss:$12 sps:$4 sm:$0xff]  }
 0x413   :  { %3435 = vmatpush1.bf16.msra.mxu0 %v5423_v38  ;;  %4783 = vmatpush3.bf16.msra.mxu1 %v5451_v56  ;;  %v5498_v56 = vld [vmem:[%s6892_s2 + $0xab8] ss:$12 sps:$4 sm:$0xff]  }
 0x414   :  { %3436 = vmatprep.subr.bf16.mxu0 %v5428_v39  ;;  %4784 = vmatprep.subr.bf16.mxu1 %v5455_v58  ;;  %v5502_v58 = vld [vmem:[%s6892_s2 + $0xad0] ss:$12 sps:$4 sm:$0xff]  }
 0x417   :  { %3437 = vmatpush1.bf16.msra.mxu0 %v5426_v40  ;;  %4785 = vmatpush3.bf16.msra.mxu1 %v5456_v59  ;;  %v5505_v59 = vld [vmem:[%s6892_s2 + $0xae4] ss:$12 sps:$4 sm:$0xff]  }
 0x418   :  { %3438 = vmatprep.subr.bf16.mxu0 %v5431_v41  ;;  %4786 = vmatprep.subr.bf16.mxu1 %v5460_v60  ;;  %v5503_v60 = vld [vmem:[%s6892_s2 + $0xae0] ss:$12 sps:$4 sm:$0xff]  }
 0x41b   :  { %3439 = vmatpush1.bf16.msra.mxu0 %v5429_v42  ;;  %4787 = vmatpush3.bf16.msra.mxu1 %v5461_v63  ;;  %v5507_v63 = vld [vmem:[%s6892_s2 + $0xaf8] ss:$12 sps:$4 sm:$0xff]  }
 0x41c   :  { %3440 = vmatprep.subr.bf16.mxu0 %v5434_v43  ;;  %4788 = vmatprep.subr.bf16.mxu1 %v5465_v0  ;;  %v5510_v0 = vld [vmem:[%s6892_s2 + $0xb00] ss:$12 sps:$4 sm:$0xff]  }
 0x41f   :  { %3441 = vmatpush1.bf16.msra.mxu0 %v5432_v44  ;;  %4789 = vmatpush3.bf16.msra.mxu1 %v5466_v5  ;;  %v5514_v5 = vld [vmem:[%s6892_s2 + $0xb18] ss:$12 sps:$4 sm:$0xff]  }
 0x420   :  { %3442 = vmatprep.subr.bf16.mxu0 %v5437_v45  ;;  %4790 = vmatprep.subr.bf16.mxu1 %v5470_v6  ;;  %v5517_v6 = vld [vmem:[%s6892_s2 + $0xb2c] ss:$12 sps:$4 sm:$0xff]  }
 0x423   :  { %3443 = vmatpush1.bf16.msra.mxu0 %v5435_v46  ;;  %4791 = vmatpush3.bf16.msra.mxu1 %v5471_v9  ;;  %v5519_v9 = vld [vmem:[%s6894_s3 + $0x40] sm:$0xff]  }
 0x424   :  { %3444 = vmatprep.subr.bf16.mxu0 %v5440_v47  ;;  %4792 = vmatprep.subr.bf16.mxu1 %v5475_v10  ;;  %v5520_v10 = vld [vmem:[%s6894_s3] sm:$0xff]  }
 0x427   :  { %3445 = vmatpush1.bf16.msra.mxu0 %v5438_v48  ;;  %4793 = vmatpush3.bf16.msra.mxu1 %v5476_v13  ;;  %v5487_v48 = vld [vmem:[%s6892_s2 + $0xa80] ss:$12 sps:$4 sm:$0xff]  }
 0x428   :  { %3446 = vmatprep.subr.bf16.mxu0 %v5443_v49  ;;  %4794 = vmatprep.subr.bf16.mxu1 %v5480_v16  ;;  %v5490_v49 = vld [vmem:[%s6892_s2 + $0xa88] ss:$12 sps:$4 sm:$0xff]  }
 0x429   :  { %v5523_v13 = vld [vmem:[%s6894_s3 + $0x8] sm:$0xff]   ;;  %v5526_v16 = vld [vmem:[%s6894_s3 + $0x10] sm:$0xff]  }
 0x42b   :  { %3447 = vmatpush1.bf16.msra.mxu0 %v5441_v50  ;;  %4795 = vmatpush3.bf16.msra.mxu1 %v5481_v18  ;;  %v5528_v18 = vld [vmem:[%s6894_s3 + $0x58] sm:$0xff]  }
 0x42c   :  { %3448 = vmatprep.subr.bf16.mxu0 %v5446_v51  ;;  %4796 = vmatprep.subr.bf16.mxu1 %v5485_v20  ;;  %v5493_v51 = vld [vmem:[%s6892_s2 + $0xa9c] ss:$12 sps:$4 sm:$0xff]  }
 0x42d   :  { %v5530_v20 = vld [vmem:[%s6894_s3 + $0x98] sm:$0xff]  }
 0x42f   :  { %3449 = vmatpush1.bf16.msra.mxu0 %v5444_v52  ;;  %4797 = vmatpush3.bf16.msra.mxu1 %v5486_v22  ;;  %v5491_v52 = vld [vmem:[%s6892_s2 + $0xa98] ss:$12 sps:$4 sm:$0xff]  }
 0x430   :  { %3450 = vmatprep.subr.bf16.mxu0 %v5449_v53  ;;  %4944 = vmatprep.subr.bf16.mxu1 %v5551_v1  ;;  %v5494_v53 = vld [vmem:[%s6892_s2 + $0xaa0] ss:$12 sps:$4 sm:$0xff]  }
 0x431   :  { %v5532_v22 = vld [vmem:[%s6894_s3 + $0x20] sm:$0xff]  }
 0x433   :  { %3451 = vmatpush1.bf16.msra.mxu0 %v5447_v55  ;;  %v5495_v55 = vld [vmem:[%s6892_s2 + $0xab0] ss:$12 sps:$4 sm:$0xff]  }
 0x434   :  { %3452 = vmatprep.subr.bf16.mxu0 %v5454_v57  ;;  %v5499_v57 = vld [vmem:[%s6892_s2 + $0xac8] ss:$12 sps:$4 sm:$0xff]  }
 0x437   :  { %3453 = vmatpush1.bf16.msra.mxu0 %v5452_v61  ;;  %v5506_v61 = vld [vmem:[%s6892_s2 + $0xae8] ss:$12 sps:$4 sm:$0xff]  }
 0x438   :  { %3454 = vmatprep.subr.bf16.mxu0 %v5459_v62  ;;  %v5509_v62 = vld [vmem:[%s6892_s2 + $0xafc] ss:$12 sps:$4 sm:$0xff]  }
 0x43b   :  { %3455 = vmatpush1.bf16.msra.mxu0 %v5457_v3  ;;  %v5513_v3 = vld [vmem:[%s6892_s2 + $0xb14] ss:$12 sps:$4 sm:$0xff]  }
 0x43c   :  { %3456 = vmatprep.subr.bf16.mxu0 %v5464_v4  ;;  %v5511_v4 = vld [vmem:[%s6892_s2 + $0xb10] ss:$12 sps:$4 sm:$0xff]  }
 0x43f   :  { %3457 = vmatpush1.bf16.msra.mxu0 %v5462_v7  ;;  %v5515_v7 = vld [vmem:[%s6892_s2 + $0xb28] ss:$12 sps:$4 sm:$0xff]  }
 0x440   :  { %3458 = vmatprep.subr.bf16.mxu0 %v5469_v8  ;;  %v5518_v8 = vld [vmem:[%s6892_s2 + $0xb30] ss:$12 sps:$4 sm:$0xff]  }
 0x443   :  { %3459 = vmatpush1.bf16.msra.mxu0 %v5467_v11  ;;  %v5521_v11 = vld [vmem:[%s6894_s3 + $0x80] sm:$0xff]  }
 0x444   :  { %3460 = vmatprep.subr.bf16.mxu0 %v5474_v12  ;;  %v5522_v12 = vld [vmem:[%s6894_s3 + $0x48] sm:$0xff]  }
 0x447   :  { %3461 = vmatpush1.bf16.msra.mxu0 %v5472_v14  ;;  %v5524_v14 = vld [vmem:[%s6894_s3 + $0x88] sm:$0xff]  }
 0x448   :  { %3462 = vmatprep.subr.bf16.mxu0 %v5479_v15  ;;  %v5525_v15 = vld [vmem:[%s6894_s3 + $0x50] sm:$0xff]  }
 0x44b   :  { %3463 = vmatpush1.bf16.msra.mxu0 %v5477_v17  ;;  %v5527_v17 = vld [vmem:[%s6894_s3 + $0x90] sm:$0xff]  }
 0x44c   :  { %3464 = vmatprep.subr.bf16.mxu0 %v5484_v19  ;;  %v5529_v19 = vld [vmem:[%s6894_s3 + $0x18] sm:$0xff]  }
 0x44f   :  { %3465 = vmatpush1.bf16.msra.mxu0 %v5482_v21  ;;  %v5531_v21 = vld [vmem:[%s6894_s3 + $0x60] sm:$0xff]  }
 0x450   :  { %3477 = vmatprep.subr.bf16.mxu0 %v5489_v23  ;;  %v5533_v23 = vld [vmem:[%s6894_s3 + $0xa0] sm:$0xff]  }
 0x4c5   :  { %v4767_v24 = vpop.f32.mrb[20].mxu0 }
 0x4c6   :  { %v4768_v25 = vpop.f32.mrb[21].mxu0 }
 0x4c7   :  { %v4769_v26 = vadd.f32 %v4768_v25, %v4767_v24  ;;  %v4770_v27 = vpop.f32.mrb[22].mxu0  ;;  %v5534_v24 = vld [vmem:[%s6894_s3 + $0x68] sm:$0xff]  }
 0x4c8   :  { %v4771_v28 = vpop.f32.mrb[23].mxu0  ;;  %v5535_v25 = vld [vmem:[%s6894_s3 + $0x28] sm:$0xff]  }
 0x4c9   :  { %v4772_v29 = vadd.f32 %v4771_v28, %v4770_v27  ;;  %v5537_v27 = vld [vmem:[%s6894_s3 + $0x70] sm:$0xff]  }
 0x4ca   :  { %v5538_v28 = vld [vmem:[%s6894_s3 + $0x30] sm:$0xff]  }
 0x4e5   :  { %v2853_v30 = vpop.f32.mrb[24].mxu1  ;;  %v2937_v31 = vpop.f32.mrb[24].mxu0 }
 0x4e6   :  { %v2938_v32 = vadd.f32 %v4769_v26, %v2937_v31  ;;  %v2855_v33 = vpop.f32.mrb[25].mxu1  ;;  %v4942_v34 = vpop.f32.mrb[25].mxu0  ;;  %v2944_v37 = vmax.f32 %v2853_v30, 0.0  ;;  %v5536_v26 = vld [vmem:[%s6894_s3 + $0xa8] sm:$0xff]   ;;  %v5540_v30 = vld [vmem:[%s6894_s3 + $0x78] sm:$0xff]  }
 0x4e7   :  { %v2857_v35 = vpop.f32.mrb[26].mxu1  ;;  %v2940_v36 = vpop.f32.mrb[26].mxu0  ;;  %v2945_v42 = vmax.f32 %v2855_v33, 0.0  ;;  %v5541_v31 = vld [vmem:[%s6894_s3 + $0x38] sm:$0xff]  }
 0x4e8   :  { %v2947_v38 = vmax.f32 %v2857_v35, 0.0  ;;  %v2941_v39 = vadd.f32 %v4772_v29, %v2940_v36  ;;  %v2859_v40 = vpop.f32.mrb[27].mxu1  ;;  %v4943_v41 = vpop.f32.mrb[27].mxu0  ;;  %v2946_v44 = vmax.f32 %v2938_v32, 0.0  ;;  %v5539_v29 = vld [vmem:[%s6894_s3 + $0xb0] sm:$0xff]   ;;  %v5542_v32 = vld [vmem:[%s6894_s3 + $0xb8] sm:$0xff]  }
 0x4e9   :  { %v2948_v43 = vmax.f32 %v2859_v40, 0.0 }
 0x4ea   :  { %v2950_v45 = vpack.c.bf16 %v2947_v38, %v2944_v37  ;;  %v2949_v46 = vmax.f32 %v2941_v39, 0.0 }
 0x4eb   :  { %v2951_v47 = vpack.c.bf16 %v2948_v43, %v2945_v42 }
 0x4ec   :  { %v2952_v50 = vpack.c.bf16 %v2949_v46, %v2946_v44 }
 0x4ed   :  { %3466 = vmatprep.mubr.bf16.mxu0 %v2951_v47  ;;  %3552 = vmatprep.mubr.bf16.mxu1 %v2951_v47 }
 0x4ee   :  { %3467 = vmatmul.mubr.bf16.vlgmr.msra.gmra.mrb[28].mxu0 %v2950_v45  ;;  %3553 = vmatmul.mubr.bf16.vlgmr.msra.gmra.mrb[28].mxu1 %v2950_v45 }
 0x4ef   :  { %3478 = vmatpush1.bf16.msra.mxu0 %v5487_v48  ;;  %4945 = vmatpush3.bf16.msra.mxu1 %v5490_v49 }
 0x4f0   :  { %3479 = vmatprep.subr.bf16.mxu0 %v5493_v51  ;;  %4946 = vmatprep.subr.bf16.mxu1 %v5551_v1 }
 0x4f1   :  { %3509 = vmatprep.mubr.bf16.mxu0 %v5552_v2  ;;  %4960 = vmatprep.mubr.msk.bf16.mxu1 %vm5553_vm0, %v5551_v1  ;;  %v5501_v2 = vld [vmem:[%s6892_s2 + $0xacc] ss:$12 sps:$4 sm:$0xff]  }
 0x4f3   :  { %3480 = vmatpush1.bf16.msra.mxu0 %v5491_v52  ;;  %4947 = vmatpush3.bf16.msra.mxu1 %v5494_v53 }
 0x4f4   :  { %3481 = vmatprep.subr.bf16.mxu0 %v5497_v54  ;;  %4948 = vmatprep.subr.bf16.mxu1 %v5551_v1 }
 0x4f7   :  { %3482 = vmatpush1.bf16.msra.mxu0 %v5495_v55  ;;  %4949 = vmatpush3.bf16.msra.mxu1 %v5498_v56 }
 0x4f8   :  { %3483 = vmatprep.subr.bf16.mxu0 %v5501_v2  ;;  %4950 = vmatprep.subr.bf16.mxu1 %v5551_v1 }
 0x4fb   :  { %3484 = vmatpush1.bf16.msra.mxu0 %v5499_v57  ;;  %4951 = vmatpush3.bf16.msra.mxu1 %v5502_v58 }
 0x4fc   :  { %3485 = vmatprep.subr.bf16.mxu0 %v5505_v59  ;;  %4952 = vmatprep.subr.bf16.mxu1 %v5551_v1 }
 0x4ff   :  { %3486 = vmatpush1.bf16.msra.mxu0 %v5503_v60  ;;  %4953 = vmatpush3.bf16.msra.mxu1 %v5506_v61 }
 0x500   :  { %3487 = vmatprep.subr.bf16.mxu0 %v5509_v62  ;;  %4954 = vmatprep.subr.bf16.mxu1 %v5551_v1 }
 0x503   :  { %3488 = vmatpush1.bf16.msra.mxu0 %v5507_v63  ;;  %4955 = vmatpush3.bf16.msra.mxu1 %v5510_v0 }
 0x504   :  { %3489 = vmatprep.subr.bf16.mxu0 %v5513_v3  ;;  %4956 = vmatprep.subr.bf16.mxu1 %v5551_v1 }
 0x507   :  { %3490 = vmatpush1.bf16.msra.mxu0 %v5511_v4  ;;  %4957 = vmatpush3.bf16.msra.mxu1 %v5514_v5 }
 0x508   :  { %3491 = vmatprep.subr.bf16.mxu0 %v5517_v6  ;;  %4958 = vmatprep.subr.bf16.mxu1 %v5551_v1 }
 0x50b   :  { %3492 = vmatpush1.bf16.msra.mxu0 %v5515_v7  ;;  %4959 = vmatpush3.bf16.msra.mxu1 %v5518_v8 }
 0x50c   :  { %4964 = vmatprep.subr.bf16.mxu0 %v5551_v1  ;;  %4813 = vmatprep.subr.bf16.mxu1 %v5519_v9 }
 0x50e   :  { %3510 = vmatmul.mubr.bf16.vlgmr.msra.gmra.mrb[28].mxu0 %v2952_v50  ;;  %4961 = vmatmul.mubr.bf16.vlgmr.msra.gmra.mrb[32].mxu1 %v2952_v50 }
 0x50f   :  { %4980 = vmatprep.mubr.msk.bf16.mxu0 %vm5553_vm0, %v5551_v1  ;;  %4814 = vmatpush3.bf16.msra.mxu1 %v5520_v10 }
 0x510   :  { %4965 = vmatpush3.bf16.msra.mxu0 %v5521_v11  ;;  %4815 = vmatprep.subr.bf16.mxu1 %v5522_v12 }
 0x511   :  { %4966 = vmatprep.subr.bf16.mxu0 %v5551_v1 }
 0x513   :  { %4816 = vmatpush3.bf16.msra.mxu1 %v5523_v13 }
 0x514   :  { %4967 = vmatpush3.bf16.msra.mxu0 %v5524_v14  ;;  %4817 = vmatprep.subr.bf16.mxu1 %v5525_v15 }
 0x515   :  { %4968 = vmatprep.subr.bf16.mxu0 %v5551_v1 }
 0x517   :  { %4818 = vmatpush3.bf16.msra.mxu1 %v5526_v16 }
 0x518   :  { %4969 = vmatpush3.bf16.msra.mxu0 %v5527_v17  ;;  %4819 = vmatprep.subr.bf16.mxu1 %v5528_v18 }
 0x519   :  { %4970 = vmatprep.subr.bf16.mxu0 %v5551_v1 }
 0x51b   :  { %4820 = vmatpush3.bf16.msra.mxu1 %v5529_v19 }
 0x51c   :  { %4971 = vmatpush3.bf16.msra.mxu0 %v5530_v20  ;;  %4821 = vmatprep.subr.bf16.mxu1 %v5531_v21 }
 0x51d   :  { %4972 = vmatprep.subr.bf16.mxu0 %v5551_v1 }
 0x51f   :  { %4822 = vmatpush3.bf16.msra.mxu1 %v5532_v22 }
 0x520   :  { %4973 = vmatpush3.bf16.msra.mxu0 %v5533_v23  ;;  %4823 = vmatprep.subr.bf16.mxu1 %v5534_v24 }
 0x521   :  { %4974 = vmatprep.subr.bf16.mxu0 %v5551_v1 }
 0x523   :  { %4824 = vmatpush3.bf16.msra.mxu1 %v5535_v25 }
 0x524   :  { %4975 = vmatpush3.bf16.msra.mxu0 %v5536_v26  ;;  %4825 = vmatprep.subr.bf16.mxu1 %v5537_v27 }
 0x525   :  { %4976 = vmatprep.subr.bf16.mxu0 %v5551_v1 }
 0x527   :  { %4826 = vmatpush3.bf16.msra.mxu1 %v5538_v28 }
 0x528   :  { %4977 = vmatpush3.bf16.msra.mxu0 %v5539_v29  ;;  %4827 = vmatprep.subr.bf16.mxu1 %v5540_v30 }
 0x529   :  { %4978 = vmatprep.subr.bf16.mxu0 %v5551_v1 }
 0x52b   :  { %4828 = vmatpush3.bf16.msra.mxu1 %v5541_v31 }
 0x52c   :  { %4979 = vmatpush3.bf16.msra.mxu0 %v5542_v32 }
 0x5c1   :  { %v4798_v33 = vpop.f32.mrb[28].mxu1 }
 0x5c2   :  { %v4799_v34 = vpop.f32.mrb[29].mxu1 }
 0x5c3   :  { %v4800_v35 = vadd.f32 %v4799_v34, %v4798_v33  ;;  %v4801_v36 = vpop.f32.mrb[30].mxu1 }
 0x5c4   :  { %v4802_v37 = vpop.f32.mrb[31].mxu1 }
 0x5c5   :  { %v4803_v38 = vadd.f32 %v4802_v37, %v4801_v36 }
 0x5e1   :  { %v3511_v39 = vpop.f32.mrb[28].mxu0  ;;  %v3595_v40 = vpop.f32.mrb[32].mxu1 }
 0x5e2   :  { %v3596_v1 = vadd.f32 %v4800_v35, %v3595_v40  ;;  %v3513_v41 = vpop.f32.mrb[29].mxu0  ;;  %v4962_v42 = vpop.f32.mrb[33].mxu1  ;;  %v3602_v45 = vmax.f32 %v3511_v39, 0.0 }
 0x5e3   :  { %v3515_v43 = vpop.f32.mrb[30].mxu0  ;;  %v3598_v44 = vpop.f32.mrb[34].mxu1  ;;  %v3603_v50 = vmax.f32 %v3513_v41, 0.0 }
 0x5e4   :  { %v3605_v46 = vmax.f32 %v3515_v43, 0.0  ;;  %v3599_v47 = vadd.f32 %v4803_v38, %v3598_v44  ;;  %v3517_v48 = vpop.f32.mrb[31].mxu0  ;;  %v4963_v49 = vpop.f32.mrb[35].mxu1  ;;  %v3604_v52 = vmax.f32 %v3596_v1, 0.0 }
 0x5e5   :  { %v3606_v51 = vmax.f32 %v3517_v48, 0.0 }
 0x5e6   :  { %v3608_v53 = vpack.c.bf16 %v3605_v46, %v3602_v45  ;;  %v3607_v54 = vmax.f32 %v3599_v47, 0.0 }
 0x5e7   :  { %v3609_v55 = vpack.c.bf16 %v3606_v51, %v3603_v50 }
 0x5e8   :  { %v3610_v56 = vpack.c.bf16 %v3607_v54, %v3604_v52 }
 0x5e9   :  { %3787 = vmatprep.mubr.bf16.mxu1 %v3609_v55 }
 0x5ea   :  { %3788 = vmatmul.mubr.bf16.vlgmr.msra.gmra.mrb[36].mxu1 %v3608_v53  ;;  %4981 = vmatmul.mubr.bf16.vlgmr.msra.gmra.mrb[32].mxu0 %v3610_v56 }
 0x6bd   :  { %v4829_v2 = vpop.f32.mrb[36].mxu1  ;;  %v3830_v57 = vpop.f32.mrb[32].mxu0 }
 0x6be   :  { %v4830_v58 = vpop.f32.mrb[37].mxu1  ;;  %v4982_v59 = vpop.f32.mrb[33].mxu0 }
 0x6bf   :  { %v4831_v60 = vadd.f32 %v4830_v58, %v4829_v2  ;;  %v4832_v61 = vpop.f32.mrb[38].mxu1  ;;  %v3833_v62 = vpop.f32.mrb[34].mxu0 }
 0x6c0   :  { %v4833_v63 = vpop.f32.mrb[39].mxu1  ;;  %v4983_v0 = vpop.f32.mrb[35].mxu0 }
 0x6c1   :  { %v3831_v3 = vadd.f32 %v4831_v60, %v3830_v57  ;;  %v4834_v4 = vadd.f32 %v4833_v63, %v4832_v61 }
 0x6c3   :  { %v4647_v5 = vmul.f32 -1.442695, %v3831_v3  ;;  %v3834_v6 = vadd.f32 %v4834_v4, %v3833_v62 }
 0x6c5   :  { %5543 = vpow2.f32 %v4647_v5  ;;  %v4648_v7 = vmul.f32 -1.442695, %v3834_v6 }
 0x6c7   :  { %5545 = vpow2.f32 %v4648_v7 }
 0x6cf   :  { %v5544_v8 = vpop.eup %5543 }
 0x6d0   :  { %v3843_v9 = vadd.f32 1.0, %v5544_v8 }
 0x6d1   :  { %v5546_v10 = vpop.eup %5545 }
 0x6d2   :  { %5547 = vrcp.f32 %v3843_v9  ;;  %v3844_v11 = vadd.f32 1.0, %v5546_v10 }
 0x6d4   :  { %5549 = vrcp.f32 %v3844_v11 }
 0x6dc   :  { %v5548_v12 = vpop.eup %5547 }
 0x6dd   :  { %3849 = vst [vmem:[%s6895_s4] sm:$0xff] %v5548_v12 }
 0x6de   :  { %v5550_v13 = vpop.eup %5549 }
 0x6df   :  { %3850 = vst [vmem:[%s6895_s4 + $0x8] sm:$0xff] %v5550_v13 }

</bundles_post_ra>
